<compile_context>
chip_gen: v5e
topology: v5e:2x2
jax: 0.10.0
libtpu: 0.0.40
codegen_flags: <defaults>
</compile_context>

<pallas_src>
import jax
import jax.numpy as jnp
from jax import lax
from jax.experimental import pallas as pl
from jax.experimental.pallas import tpu as pltpu


def pose_head_kernel(x_ref, w_ref, bc_ref, mp_ref, wf_ref, bf_ref, out_ref):
    """One grid step: a block of nb frames -> nb pose vectors (lane-padded).

    x_ref : (nb*HW, 27)  bf16  im2col patches, taps*channels on lanes
    w_ref : (27, F)      bf16  conv3x3 weights, tap-major / channel-minor
    bc_ref: (1, F)       f32   conv bias
    mp_ref: (nb, nb*HW)  f32   block-diagonal average-pool matrix
    wf_ref: (F, 128)     f32   fc weights zero-padded 6 -> 128 lanes
    bf_ref: (1, 128)     f32   fc bias zero-padded
    out   : (nb, 128)    f32   pose params (first 6 lanes valid)
    """
    # Conv3x3 over all nb frames as ONE bf16 MXU matmul, f32 accumulation.
    feat = jnp.dot(x_ref[...], w_ref[...], preferred_element_type=jnp.float32)
    feat = jnp.maximum(feat + bc_ref[...], 0.0)          # bias + ReLU (f32 VPU)
    # Global average pool per frame: one MXU matmul (K = nb*HW).
    pooled = jnp.dot(mp_ref[...], feat, preferred_element_type=jnp.float32)
    # Linear head, lane-padded to 128 so the store is a full-lane vst.
    pose = jnp.dot(pooled, wf_ref[...], preferred_element_type=jnp.float32)
    out_ref[...] = pose + bf_ref[...]


def init_params(key, in_ch, hidden):
    k1, k2, k3, k4 = jax.random.split(key, 4)
    wtap = jax.random.normal(k1, (9, in_ch, hidden), jnp.float32) * 0.1
    bc = jax.random.normal(k2, (1, hidden), jnp.float32) * 0.01
    wf = jax.random.normal(k3, (hidden, 6), jnp.float32) * 0.1
    bf = jax.random.normal(k4, (1, 6), jnp.float32) * 0.01
    return wtap, bc, wf, bf


def _im2col_taps(x_nhwc):
    """[N,H,W,C] -> [N*H*W, 9*C] 3x3(pad=1) patches, tap-major / channel-minor."""
    N, H, W, C = x_nhwc.shape
    xp = jnp.pad(x_nhwc, ((0, 0), (1, 1), (1, 1), (0, 0)))
    taps = [xp[:, dy:dy + H, dx:dx + W, :] for dy in range(3) for dx in range(3)]
    patches = jnp.stack(taps, axis=3)                       # [N, H, W, 9, C]
    return patches.reshape(N * H * W, 9 * C)


def pose_extractor(video, params, nb=8):
    """video: [B, T, C, H, W] f32 -> poses [B, T, 6] f32."""
    B, T, C, H, W = video.shape
    N, HW = B * T, H * W
    assert nb % 8 == 0, "frame block must be a multiple of 8 (sublane tiling)"
    assert N % nb == 0, "frame count must be divisible by the frame block"

    wtap, bc, wf, bf = params
    F = wtap.shape[2]
    K = 9 * C
    OUT_PAD = 128

    # Host-side glue (cheap XLA ops): NCHW -> NHWC, 3x3 im2col with the 27
    # taps on the lane axis, bf16 for the HBM->VMEM DMA.
    frames = jnp.transpose(video.reshape(N, C, H, W), (0, 2, 3, 1))
    patches = _im2col_taps(frames).astype(jnp.bfloat16)      # (N*HW, 9C)

    w27 = wtap.reshape(K, F).astype(jnp.bfloat16)            # (9C, F) bf16
    # Block-diagonal mean-pool matrix: row n averages frame n's HW pixels.
    rows = jnp.arange(nb * HW) // HW
    mpool = (rows[None, :] == jnp.arange(nb)[:, None]).astype(jnp.float32) / HW
    wf_pad = jnp.zeros((F, OUT_PAD), jnp.float32).at[:, :6].set(wf)
    bf_pad = jnp.zeros((1, OUT_PAD), jnp.float32).at[:, :6].set(bf)

    # Honest, lane-padded VMEM budget (v7x has only 64 MiB physical VMEM).
    in_block = nb * HW * 128 * 2          # bf16 input block, 128-lane tiles
    feat_blk = nb * HW * 128 * 4          # f32 conv output / ReLU temporary
    mp_blk = nb * max(nb * HW, 128) * 4
    vmem_needed = 2 * in_block + 3 * feat_blk + 2 * mp_blk + (2 << 20)
    assert vmem_needed <= 48 * 1024 * 1024, (
        "frame block too large for VMEM; reduce nb")
    vmem_limit = int(min(max(vmem_needed, 16 * 1024 * 1024), 48 * 1024 * 1024))

    out = pl.pallas_call(
        pose_head_kernel,
        out_shape=jax.ShapeDtypeStruct((N, OUT_PAD), jnp.float32),
        grid_spec=pltpu.PrefetchScalarGridSpec(
            num_scalar_prefetch=0,
            grid=(N // nb,),
            in_specs=[
                pl.BlockSpec((nb * HW, K), lambda i: (i, 0)),
                pl.BlockSpec((K, F), lambda i: (0, 0)),
                pl.BlockSpec((1, F), lambda i: (0, 0)),
                pl.BlockSpec((nb, nb * HW), lambda i: (0, 0)),
                pl.BlockSpec((F, OUT_PAD), lambda i: (0, 0)),
                pl.BlockSpec((1, OUT_PAD), lambda i: (0, 0)),
            ],
            out_specs=pl.BlockSpec((nb, OUT_PAD), lambda i: (i, 0)),
        ),
        compiler_params=pltpu.CompilerParams(
            dimension_semantics=("parallel",),
            vmem_limit_bytes=vmem_limit),
    )(patches, w27, bc, mpool, wf_pad, bf_pad)

    return out[:, :6].reshape(B, T, 6)


def _im2col_ref(x_nhwc):
    N, H, W, C = x_nhwc.shape
    return _im2col_taps(x_nhwc).reshape(N, H * W, 9 * C)


def pose_extractor_ref(video, params):
    """Pure-JAX reference mirroring the PyTorch per-frame loop + stack."""
    B, T, C, H, W = video.shape
    wtap, bc, wf, bf = params
    # Same stand-in-net quantization as the kernel path (bf16 conv operands).
    wc = wtap.reshape(9 * C, wtap.shape[2]).astype(jnp.bfloat16).astype(jnp.float32)
    vq = video.astype(jnp.bfloat16).astype(jnp.float32)
    outs = []
    for t in range(T):
        frame = jnp.transpose(vq[:, t], (0, 2, 3, 1))            # [B,H,W,C]
        patches = _im2col_ref(frame)                             # [B,HW,9C]
        feat = jnp.maximum(
            jnp.einsum('bpk,kf->bpf', patches, wc,
                       precision=lax.Precision.HIGHEST) + bc[None], 0.0)
        pooled = jnp.mean(feat, axis=1)                          # [B,F]
        outs.append(jnp.dot(pooled, wf,
                            precision=lax.Precision.HIGHEST) + bf)
    return jnp.stack(outs, axis=1)                               # [B,T,6]


if __name__ == "__main__":
    key = jax.random.PRNGKey(0)
    k_vid, k_par = jax.random.split(key)

    B, T, C, H, W = 2, 32, 3, 16, 16
    hidden = 32
    video = jax.random.normal(k_vid, (B, T, C, H, W), jnp.float32)
    params = init_params(k_par, C, hidden)

    poses = jax.block_until_ready(pose_extractor(video, params, nb=8))
    ref = pose_extractor_ref(video, params)

    assert poses.shape == (B, T, 6), poses.shape
    assert jnp.allclose(poses, ref, rtol=1e-2, atol=1e-2), \
        float(jnp.max(jnp.abs(poses - ref)))

    print("KERNEL_OK")
</pallas_src>

<mosaic_0001>
module attributes {stable_mosaic.version = 11 : i64} {
  func.func @pose_head_kernel(%arg0: i32, %arg1: memref<2048x27xbf16, #tpu.memory_space<vmem>>, %arg2: memref<27x32xbf16, #tpu.memory_space<vmem>>, %arg3: memref<1x32xf32, #tpu.memory_space<vmem>>, %arg4: memref<8x2048xf32, #tpu.memory_space<vmem>>, %arg5: memref<32x128xf32, #tpu.memory_space<vmem>>, %arg6: memref<1x128xf32, #tpu.memory_space<vmem>>, %arg7: memref<8x128xf32, #tpu.memory_space<vmem>>) attributes {dimension_semantics = [#tpu.dimension_semantics<parallel>], iteration_bounds = array<i64: 8>, scalar_prefetch = 0 : i64, scratch_operands = 0 : i64, tpu.core_type = #tpu.core_type<tc>, window_params = [{transform_indices = @transform_0, window_bounds = array<i64: 2048, 27>}, {pipeline_mode = #tpu.pipeline_mode<synchronous>, transform_indices = @transform_1, window_bounds = array<i64: 27, 32>}, {pipeline_mode = #tpu.pipeline_mode<synchronous>, transform_indices = @transform_2, window_bounds = array<i64: 1, 32>}, {pipeline_mode = #tpu.pipeline_mode<synchronous>, transform_indices = @transform_3, window_bounds = array<i64: 8, 2048>}, {pipeline_mode = #tpu.pipeline_mode<synchronous>, transform_indices = @transform_4, window_bounds = array<i64: 32, 128>}, {pipeline_mode = #tpu.pipeline_mode<synchronous>, transform_indices = @transform_5, window_bounds = array<i64: 1, 128>}, {transform_indices = @transform_6, window_bounds = array<i64: 8, 128>}]} {
    %c0 = arith.constant 0 : index
    %c0_0 = arith.constant 0 : index
    %0 = vector.load %arg1[%c0, %c0_0] : memref<2048x27xbf16, #tpu.memory_space<vmem>>, vector<2048x27xbf16>
    %c0_1 = arith.constant 0 : index
    %c0_2 = arith.constant 0 : index
    %1 = vector.load %arg2[%c0_1, %c0_2] : memref<27x32xbf16, #tpu.memory_space<vmem>>, vector<27x32xbf16>
    %cst = arith.constant dense<0.000000e+00> : vector<2048x32xf32>
    %2 = tpu.matmul %0, %1, %cst {dimension_numbers = #tpu.dot_dimension_numbers<[1], [0], [0], [1], [0, 0, 1, 1], [], []>} : vector<2048x27xbf16>, vector<27x32xbf16>, vector<2048x32xf32> -> vector<2048x32xf32>
    %c0_3 = arith.constant 0 : index
    %c0_4 = arith.constant 0 : index
    %3 = vector.load %arg3[%c0_3, %c0_4] : memref<1x32xf32, #tpu.memory_space<vmem>>, vector<1x32xf32>
    %4 = vector.broadcast %3 : vector<1x32xf32> to vector<2048x32xf32>
    %5 = arith.addf %2, %4 : vector<2048x32xf32>
    %cst_5 = arith.constant 0.000000e+00 : f32
    %6 = vector.broadcast %cst_5 : f32 to vector<2048x32xf32>
    %7 = arith.maximumf %5, %6 : vector<2048x32xf32>
    %c0_6 = arith.constant 0 : index
    %c0_7 = arith.constant 0 : index
    %8 = vector.load %arg4[%c0_6, %c0_7] : memref<8x2048xf32, #tpu.memory_space<vmem>>, vector<8x2048xf32>
    %cst_8 = arith.constant dense<0.000000e+00> : vector<8x32xf32>
    %9 = tpu.matmul %8, %7, %cst_8 {dimension_numbers = #tpu.dot_dimension_numbers<[1], [0], [0], [1], [0, 0, 1, 1], [], []>} : vector<8x2048xf32>, vector<2048x32xf32>, vector<8x32xf32> -> vector<8x32xf32>
    %c0_9 = arith.constant 0 : index
    %c0_10 = arith.constant 0 : index
    %10 = vector.load %arg5[%c0_9, %c0_10] : memref<32x128xf32, #tpu.memory_space<vmem>>, vector<32x128xf32>
    %cst_11 = arith.constant dense<0.000000e+00> : vector<8x128xf32>
    %11 = tpu.matmul %9, %10, %cst_11 {dimension_numbers = #tpu.dot_dimension_numbers<[1], [0], [0], [1], [0, 0, 1, 1], [], []>} : vector<8x32xf32>, vector<32x128xf32>, vector<8x128xf32> -> vector<8x128xf32>
    %c0_12 = arith.constant 0 : index
    %c0_13 = arith.constant 0 : index
    %12 = vector.load %arg6[%c0_12, %c0_13] : memref<1x128xf32, #tpu.memory_space<vmem>>, vector<1x128xf32>
    %13 = vector.broadcast %12 : vector<1x128xf32> to vector<8x128xf32>
    %14 = arith.addf %11, %13 : vector<8x128xf32>
    %c0_14 = arith.constant 0 : index
    %c0_15 = arith.constant 0 : index
    %15 = vector.load %arg7[%c0_14, %c0_15] : memref<8x128xf32, #tpu.memory_space<vmem>>, vector<8x128xf32>
    tpu.vector_store %arg7[%c0_14, %c0_15], %14 {strides = array<i32>} : memref<8x128xf32, #tpu.memory_space<vmem>>, vector<8x128xf32>,
    return
  }
  func.func @transform_0(%arg0: i32) -> (i32, i32) {
    %c0_i32 = arith.constant 0 : i32
    %c0_i32_0 = arith.constant 0 : i32
    return %arg0, %c0_i32 : i32, i32
  }
  func.func @transform_1(%arg0: i32) -> (i32, i32) {
    %c0_i32 = arith.constant 0 : i32
    %c0_i32_0 = arith.constant 0 : i32
    %c0_i32_1 = arith.constant 0 : i32
    return %c0_i32, %c0_i32_0 : i32, i32
  }
  func.func @transform_2(%arg0: i32) -> (i32, i32) {
    %c0_i32 = arith.constant 0 : i32
    %c0_i32_0 = arith.constant 0 : i32
    %c0_i32_1 = arith.constant 0 : i32
    return %c0_i32, %c0_i32_0 : i32, i32
  }
  func.func @transform_3(%arg0: i32) -> (i32, i32) {
    %c0_i32 = arith.constant 0 : i32
    %c0_i32_0 = arith.constant 0 : i32
    %c0_i32_1 = arith.constant 0 : i32
    return %c0_i32, %c0_i32_0 : i32, i32
  }
  func.func @transform_4(%arg0: i32) -> (i32, i32) {
    %c0_i32 = arith.constant 0 : i32
    %c0_i32_0 = arith.constant 0 : i32
    %c0_i32_1 = arith.constant 0 : i32
    return %c0_i32, %c0_i32_0 : i32, i32
  }
  func.func @transform_5(%arg0: i32) -> (i32, i32) {
    %c0_i32 = arith.constant 0 : i32
    %c0_i32_0 = arith.constant 0 : i32
    %c0_i32_1 = arith.constant 0 : i32
    return %c0_i32, %c0_i32_0 : i32, i32
  }
  func.func @transform_6(%arg0: i32) -> (i32, i32) {
    %c0_i32 = arith.constant 0 : i32
    %c0_i32_0 = arith.constant 0 : i32
    return %arg0, %c0_i32 : i32, i32
  }
}

</mosaic_0001>

<bundles_post_ra>
// kernel: tpu_custom_call.1
= control target key start
LH: loop header
LB: loop body
LE: loop exit
PB: predicated region body
PF: predicated region fallthrough
CT: control target
= control target key end

     0   :  { %11 = vsyncpa [#allocation3], 0  ;;  %s5185_s0 = inlined_call_operand.vmem [shape: bf16[16384,27], index: 0, kind: input, shape index: {}]   ;;  %s5186_s1 = inlined_call_operand.vmem [shape: bf16[27,32], index: 1, kind: input, shape index: {}]   ;;  %s5187_s2 = inlined_call_operand.vmem [shape: f32[1,32], index: 2, kind: input, shape index: {}]   ;;  %s5188_s3 = inlined_call_operand.vmem [shape: f32[8,2048], index: 3, kind: input, shape index: {}]   ;;  %s5189_s4 = inlined_call_operand.vmem [shape: f32[32,128], index: 4, kind: input, shape index: {}]   ;;  %s5190_s5 = inlined_call_operand.vmem [shape: f32[1,128], index: 5, kind: input, shape index: {}]   ;;  %s5191_s6 = inlined_call_operand.hbm [shape: f32[64,128], index: 6, kind: output, shape index: {}]  }
   0x1   :  { %13 = vsyncpa [#allocation3 + $0x1], 0  ;;  %s3849_s21 = smov 0   ;;  %s3851_s22 = smov 0  }
   0x2   :  { %s3853_s23 = smov 0   ;;  %s3855_s24 = smov 0  }
   0x3 LB: > { %s3870_s25 = sadd.s32 4294967295, %s3811_s24   ;;  %s2909_s26 = sadd.s32 4294967294, %s3811_s24   ;;  %s3811_s24 = sphi %s3855_s24, %s5383_s24   ;;  %s3807_s23 = sphi %s3853_s23, %s5382_s23   ;;  %s3803_s22 = sphi %s3851_s22, %s5381_s22   ;;  %s3799_s21 = sphi %s3849_s21, %s5380_s21  }
   0x4   : > { %s3874_s27 = sadd.s32 1, %s3811_s24   ;;  %s157_s28 = sadd.s32 1, %s3807_s23 }
   0x5   : > { %s154_s29 = ssub.s32 %s3811_s24, %s3874_s27  ;;  %p167_p0 = scmp.ne.s32.totalorder %s3807_s23, %s3803_s22 }
   0x6   : > { %p155_p1 = scmp.eq.s32.totalorder %s154_s29, 0  ;;  %p168_p2 = scmp.eq.s32.totalorder %s3870_s25, 7 }
   0x7   : > { %p173_p3 = scmp.ne.s32.totalorder %s3803_s22, %s3799_s21  ;;  %p174_p4 = scmp.eq.s32.totalorder %s2909_s26, 7 }
   0x8   : > { %s3885_s30 = scalar_select %p155_p1, %s3807_s23, %s157_s28  }
   0x9   : > { %p3887_p5 = por %p168_p2, %p167_p0  ;;  %p3891_p6 = por %p174_p4, %p173_p3 }
   0xa   : > { %p2912_p7 = scmp.ge.s32.totalorder %s3811_s24, 1  ;;  %p216_p8 = scmp.lt.s32.totalorder %s3811_s24, 9 }
   0xc   : > { %p217_p9 = pnand %p2912_p7, %p216_p8 }
   0xe   : > { %220 = sbr.rel (%p217_p9) target bundleno = 1196 (0x4ac), region = 44 }
  0x13   : > { %v3434_v0 = vld [vmem:[%s5186_s1 + $0x8] sm:$0xf]  ;;  %v3698_v1 = vld [vmem:[%s5186_s1 + $0x8] sm:$0x30]  ;;  %vm1553_vm0 = vcmask 1044480   ;;  %vm1554_vm1 = vcmask 1045504  }
  0x14   : > { %v3435_v2 = vor.u32 %v3698_v1, %v3434_v0  ;;  %s2914_s13 = sshll.u32 %s3870_s25, 8  ;;  %v3813_v3 = vmov 65535   ;;  %v3697_v7 = vld [vmem:[%s5186_s1] sm:$0xff]  ;;  %vm1168_vm2 = vcmask 220160   ;;  %vm2809_vm3 = vcmask 261120   ;;  %s243_s26 = sand.u32 1, %s3803_s22  }
  0x15   : > { %v1555_v4 = vsel %vm1553_vm0, 4294967295, %v3813_v3  ;;  %p247_p10 = scmp.lt.s32.totalorder %s2914_s13, 2047  ;;  %s2913_s28 = sshll.u32 %s243_s26, 3 }
  0x16   : > { %v1556_v5 = vsel %vm1554_vm1, %v1555_v4, 0  ;;  %s3566_s29 = sshll.u32 %s3870_s25, 3  ;;  %s245_s14 = scalar_lea.vmem [#allocation2], %s2913_s28 }
  0x17   : > { %v1558_v6 = vand.u32 %v3435_v2, %v1556_v5  ;;  %s5385_s13 = smov (!%p247_p10, %s2914_s13), 2047  ;;  %s2845_s11 = scalar_lea.hbm %s5191_s6, %s3566_s29 }
  0x18   : > { %s2915_s16 = sshll.u32 %s5385_s13, 2  ;;  %s2847_s15 = sshll.u32 %s245_s14, 4  ;;  %s2848_s15 = int_to_ptr.vmem [resolvable:$true] %s2847_s15 }
  0x19   : > { %1566 = vmatpush.bf16.msra.mxu0 %v1558_v6  ;;  %3701 = vmatpush.bf16.msra.mxu3 %v1558_v6  ;;  %s3910_s19 = scalar_lea.vmem %s5185_s0, %s2915_s16  ;;  %s2849_s16 = sshll.u32 %s2845_s11, 4  ;;  %s2850_s16 = int_to_ptr.hbm [resolvable:$true] %s2849_s16 }
  0x1a   : > { %3700 = vmatpush.bf16.msra.mxu2 %v1558_v6  ;;  %3699 = vmatpush.bf16.msra.mxu1 %v1558_v6  ;;  %v3569_v8 = vld [vmem:[%s3910_s19] sm:$0xff]  ;;  %v3636_v9 = vld [vmem:[%s3910_s19 + $0x218] sm:$0xff]  ;;  %v3570_v11 = vld [vmem:[%s3910_s19 + $0x8] sm:$0xff]  ;;  %s2835_s17 = scalar_lea.sflag [#allocation3], %s243_s26  ;;  %s3763_s18 = sshra.s32 %s2850_s16, 4  ;;  %s3764_s18 = int_to_ptr.hbm [resolvable:$true] %s3763_s18 }
  0x1b   : > { %v3609_v10 = vld [vmem:[%s3910_s19 + $0x140] sm:$0xff]  ;;  %v3610_v13 = vld [vmem:[%s3910_s19 + $0x148] sm:$0xff]  ;;  %v3571_v14 = vld [vmem:[%s3910_s19 + $0x10] sm:$0xff]  ;;  %s3765_s25 = scalar_lea.hbm %s3764_s18, 8  ;;  %s3769_s29 = scalar_lea.hbm %s5191_s6, 64 }
  0x1c   : > { %v3637_v12 = vld [vmem:[%s3910_s19 + $0x220] sm:$0xff]  ;;  %v3638_v15 = vld [vmem:[%s3910_s19 + $0x228] sm:$0xff]  ;;  %v3611_v17 = vld [vmem:[%s3910_s19 + $0x150] sm:$0xff]  ;;  %p3766_p11 = scmp.ne.s32.totalorder %s3764_s18, %s3765_s25  ;;  %p3770_p0 = scmp.lt.s32.totalorder %s3764_s18, %s5191_s6 }
  0x1d   : > { %1567 = vmatpush.bf16.msra.mxu0 %v3697_v7  ;;  %3704 = vmatpush.bf16.msra.mxu3 %v3697_v7  ;;  %v3666_v16 = vld [vmem:[%s3910_s19 + $0x308] sm:$0xff]  ;;  %v3572_v18 = vld [vmem:[%s3910_s19 + $0x18] sm:$0xff]  ;;  %v3639_v19 = vld [vmem:[%s3910_s19 + $0x230] sm:$0xff]  ;;  %p3771_p1 = scmp.lt.s32.totalorder %s3769_s29, %s3765_s25 }
  0x1e   : > { %3703 = vmatpush.bf16.msra.mxu2 %v3697_v7  ;;  %3702 = vmatpush.bf16.msra.mxu1 %v3697_v7  ;;  %v3667_v20 = vld [vmem:[%s3910_s19 + $0x310] sm:$0xff]  ;;  %v3612_v21 = vld [vmem:[%s3910_s19 + $0x158] sm:$0xff]  ;;  %v3573_v22 = vld [vmem:[%s3910_s19 + $0x20] sm:$0xff]  ;;  %p3767_p12 = pnand %p3766_p11, %p3887_p5 }
  0x1f   : > { %v3640_v23 = vld [vmem:[%s3910_s19 + $0x238] sm:$0xff]  ;;  %v3613_v25 = vld [vmem:[%s3910_s19 + $0x160] sm:$0xff]  ;;  %v3574_v26 = vld [vmem:[%s3910_s19 + $0x28] sm:$0xff]  ;;  %p3772_p2 = por %p3771_p1, %p3770_p0 }
  0x20   : > { %3436 = vmatmul.msk.bf16.vlgmr.msra.gmra.mxu0 %vm1168_vm2, %v3569_v8  ;;  %3533 = vmatmul.msk.bf16.vlgmr.msra.gmra.mxu3 %vm1168_vm2, %v3666_v16  ;;  %v3668_v24 = vld [vmem:[%s3910_s19 + $0x318] sm:$0xff]  ;;  %v3641_v27 = vld [vmem:[%s3910_s19 + $0x240] sm:$0xff]  ;;  %v3614_v29 = vld [vmem:[%s3910_s19 + $0x168] sm:$0xff]  ;;  %p3768_p13 = pneg %p3767_p12 }
  0x21   : > { %3503 = vmatmul.msk.bf16.vlgmr.msra.gmra.mxu2 %vm1168_vm2, %v3636_v9  ;;  %3476 = vmatmul.msk.bf16.vlgmr.msra.gmra.mxu1 %vm1168_vm2, %v3609_v10  ;;  %v3669_v28 = vld [vmem:[%s3910_s19 + $0x320] sm:$0xff]  ;;  %v3575_v30 = vld [vmem:[%s3910_s19 + $0x30] sm:$0xff]  ;;  %v3642_v31 = vld [vmem:[%s3910_s19 + $0x248] sm:$0xff] }
  0x22   : > { %v3615_v32 = vld [vmem:[%s3910_s19 + $0x170] sm:$0xff]  ;;  %v3670_v33 = vld [vmem:[%s3910_s19 + $0x328] sm:$0xff]  ;;  %v3576_v34 = vld [vmem:[%s3910_s19 + $0x38] sm:$0xff]  ;;  %p3773_p3 = pnand %p3772_p2, %p3768_p13 }
  0x23   : > { %v3643_v35 = vld [vmem:[%s3910_s19 + $0x250] sm:$0xff]  ;;  %v3616_v36 = vld [vmem:[%s3910_s19 + $0x178] sm:$0xff]  ;;  %v3577_v38 = vld [vmem:[%s3910_s19 + $0x40] sm:$0xff] }
  0x24   : > { %v3671_v37 = vld [vmem:[%s3910_s19 + $0x330] sm:$0xff]  ;;  %v3644_v40 = vld [vmem:[%s3910_s19 + $0x258] sm:$0xff]  ;;  %v3617_v42 = vld [vmem:[%s3910_s19 + $0x180] sm:$0xff] }
  0x25   : > { %v3672_v45 = vld [vmem:[%s3910_s19 + $0x338] sm:$0xff]  ;;  %v3578_v47 = vld [vmem:[%s3910_s19 + $0x48] sm:$0xff]  ;;  %v3645_v50 = vld [vmem:[%s3910_s19 + $0x260] sm:$0xff] }
  0x26   : > { %v3618_v52 = vld [vmem:[%s3910_s19 + $0x188] sm:$0xff]  ;;  %v3673_v55 = vld [vmem:[%s3910_s19 + $0x340] sm:$0xff]  ;;  %v3579_v57 = vld [vmem:[%s3910_s19 + $0x50] sm:$0xff] }
  0x27   : > { %v3646_v60 = vld [vmem:[%s3910_s19 + $0x268] sm:$0xff]  ;;  %v3619_v62 = vld [vmem:[%s3910_s19 + $0x190] sm:$0xff]  ;;  %v3580_v3 = vld [vmem:[%s3910_s19 + $0x58] sm:$0xff] }
  0x28   : > { %v3674_v1 = vld [vmem:[%s3910_s19 + $0x348] sm:$0xff]  ;;  %v3647_v6 = vld [vmem:[%s3910_s19 + $0x270] sm:$0xff]  ;;  %v3620_v8 = vld [vmem:[%s3910_s19 + $0x198] sm:$0xff] }
  0x29   : > { %v3648_v16 = vld [vmem:[%s3910_s19 + $0x278] sm:$0xff] }
  0x30   : > { %3437 = vmatmul.msk.bf16.gmra.mxu0 %vm1168_vm2, %v3570_v11  ;;  %3534 = vmatmul.msk.bf16.gmra.mxu3 %vm1168_vm2, %v3667_v20  ;;  %v3675_v11 = vld [vmem:[%s3910_s19 + $0x350] sm:$0xff] }
  0x31   : > { %3504 = vmatmul.msk.bf16.gmra.mxu2 %vm1168_vm2, %v3637_v12  ;;  %3477 = vmatmul.msk.bf16.gmra.mxu1 %vm1168_vm2, %v3610_v13  ;;  %v3581_v13 = vld [vmem:[%s3910_s19 + $0x60] sm:$0xff] }
  0x40   : > { %3438 = vmatmul.msk.bf16.gmra.mxu0 %vm1168_vm2, %v3571_v14  ;;  %3535 = vmatmul.msk.bf16.gmra.mxu3 %vm1168_vm2, %v3668_v24 }
  0x41   : > { %3505 = vmatmul.msk.bf16.gmra.mxu2 %vm1168_vm2, %v3638_v15  ;;  %3478 = vmatmul.msk.bf16.gmra.mxu1 %vm1168_vm2, %v3611_v17 }
  0x50   : > { %3439 = vmatmul.msk.bf16.gmra.mxu0 %vm1168_vm2, %v3572_v18  ;;  %3536 = vmatmul.msk.bf16.gmra.mxu3 %vm1168_vm2, %v3669_v28  ;;  %v3621_v18 = vld [vmem:[%s3910_s19 + $0x1a0] sm:$0xff]  ;;  %v3622_v28 = vld [vmem:[%s3910_s19 + $0x1a8] sm:$0xff] }
  0x51   : > { %3506 = vmatmul.msk.bf16.gmra.mxu2 %vm1168_vm2, %v3639_v19  ;;  %3479 = vmatmul.msk.bf16.gmra.mxu1 %vm1168_vm2, %v3612_v21  ;;  %v3676_v21 = vld [vmem:[%s3910_s19 + $0x358] sm:$0xff] }
  0x60   : > { %3440 = vmatmul.msk.bf16.gmra.mxu0 %vm1168_vm2, %v3573_v22  ;;  %3537 = vmatmul.msk.bf16.gmra.mxu3 %vm1168_vm2, %v3670_v33  ;;  %v3583_v33 = vld [vmem:[%s3910_s19 + $0x70] sm:$0xff] }
  0x61   : > { %3507 = vmatmul.msk.bf16.gmra.mxu2 %vm1168_vm2, %v3640_v23  ;;  %3480 = vmatmul.msk.bf16.gmra.mxu1 %vm1168_vm2, %v3613_v25  ;;  %v3582_v23 = vld [vmem:[%s3910_s19 + $0x68] sm:$0xff] }
  0x70   : > { %3441 = vmatmul.msk.bf16.gmra.mxu0 %vm1168_vm2, %v3574_v26  ;;  %3538 = vmatmul.msk.bf16.gmra.mxu3 %vm1168_vm2, %v3671_v37  ;;  %v3649_v26 = vld [vmem:[%s3910_s19 + $0x280] sm:$0xff] }
  0x71   : > { %3508 = vmatmul.msk.bf16.gmra.mxu2 %vm1168_vm2, %v3641_v27  ;;  %3481 = vmatmul.msk.bf16.gmra.mxu1 %vm1168_vm2, %v3614_v29 }
  0x80   : > { %3442 = vmatmul.msk.bf16.gmra.mxu0 %vm1168_vm2, %v3575_v30  ;;  %3539 = vmatmul.msk.bf16.gmra.mxu3 %vm1168_vm2, %v3672_v45 }
  0x81   : > { %3509 = vmatmul.msk.bf16.gmra.mxu2 %vm1168_vm2, %v3642_v31  ;;  %3482 = vmatmul.msk.bf16.gmra.mxu1 %vm1168_vm2, %v3615_v32  ;;  %v3677_v31 = vld [vmem:[%s3910_s19 + $0x360] sm:$0xff] }
  0x90   : > { %3443 = vmatmul.msk.bf16.gmra.mxu0 %vm1168_vm2, %v3576_v34  ;;  %3540 = vmatmul.msk.bf16.gmra.mxu3 %vm1168_vm2, %v3673_v55  ;;  %v3584_v55 = vld [vmem:[%s3910_s19 + $0x78] sm:$0xff] }
  0x91   : > { %3510 = vmatmul.msk.bf16.gmra.mxu2 %vm1168_vm2, %v3643_v35  ;;  %3483 = vmatmul.msk.bf16.gmra.mxu1 %vm1168_vm2, %v3616_v36  ;;  %v3650_v36 = vld [vmem:[%s3910_s19 + $0x288] sm:$0xff] }
  0x9d   : > { %v3973_v39 = vpop.f32.mrf.mxu0 }
  0x9e   : > { %v3976_v41 = vpop.f32.mrf.mxu1 }
  0xa0   : > { %3444 = vmatmul.msk.bf16.gmra.mxu0 %vm1168_vm2, %v3577_v38  ;;  %3541 = vmatmul.msk.bf16.gmra.mxu3 %vm1168_vm2, %v3674_v1 }
  0xa1   : > { %3511 = vmatmul.msk.bf16.gmra.mxu2 %vm1168_vm2, %v3644_v40  ;;  %3484 = vmatmul.msk.bf16.gmra.mxu1 %vm1168_vm2, %v3617_v42  ;;  %v3623_v40 = vld [vmem:[%s3910_s19 + $0x1b0] sm:$0xff] }
  0xa3   : > { %v4093_v38 = vpop.f32.mrf.mxu3 }
  0xa4   : > { %v3982_v43 = vpop.f32.mrf.mxu2  ;;  %5196 = vst [vmem:[#allocation7_spill] sm:$0xff] %v4093_v38 }
  0xa5   : > { %v3984_v44 = vpop.f32.mrf.mxu0 }
  0xa6   : > { %v3987_v46 = vpop.f32.mrf.mxu1 }
  0xac   : > { %v3991_v48 = vpop.f32.mrf.mxu2 }
  0xad   : > { %v3993_v49 = vpop.f32.mrf.mxu0 }
  0xae   : > { %v3996_v51 = vpop.f32.mrf.mxu1 }
  0xb0   : > { %3445 = vmatmul.msk.bf16.gmra.mxu0 %vm1168_vm2, %v3578_v47  ;;  %3542 = vmatmul.msk.bf16.gmra.mxu3 %vm1168_vm2, %v3675_v11  ;;  %v3678_v47 = vld [vmem:[%s3910_s19 + $0x368] sm:$0xff] }
  0xb1   : > { %3512 = vmatmul.msk.bf16.gmra.mxu2 %vm1168_vm2, %v3645_v50  ;;  %3485 = vmatmul.msk.bf16.gmra.mxu1 %vm1168_vm2, %v3618_v52  ;;  %v4103_v52 = vpop.f32.mrf.mxu3 }
  0xb2   : > { %5198 = vst [vmem:[#allocation9_spill] sm:$0xff] %v4103_v52 }
  0xb4   : > { %v4002_v53 = vpop.f32.mrf.mxu2 }
  0xb5   : > { %v4004_v54 = vpop.f32.mrf.mxu0 }
  0xb6   : > { %v4007_v56 = vpop.f32.mrf.mxu1 }
  0xbc   : > { %v4011_v58 = vpop.f32.mrf.mxu2 }
  0xbd   : > { %v4013_v59 = vpop.f32.mrf.mxu0 }
  0xbe   : > { %v4016_v61 = vpop.f32.mrf.mxu1 }
  0xc0   : > { %3446 = vmatmul.msk.bf16.gmra.mxu0 %vm1168_vm2, %v3579_v57  ;;  %3543 = vmatmul.msk.bf16.gmra.mxu3 %vm1168_vm2, %v3676_v21  ;;  %v3679_v21 = vld [vmem:[%s3910_s19 + $0x370] sm:$0xff] }
  0xc1   : > { %3513 = vmatmul.msk.bf16.gmra.mxu2 %vm1168_vm2, %v3646_v60  ;;  %3486 = vmatmul.msk.bf16.gmra.mxu1 %vm1168_vm2, %v3619_v62  ;;  %v3651_v62 = vld [vmem:[%s3910_s19 + $0x290] sm:$0xff] }
  0xc4   : > { %v4022_v63 = vpop.f32.mrf.mxu2 }
  0xc5   : > { %v4024_v0 = vpop.f32.mrf.mxu0 }
  0xc6   : > { %v4027_v2 = vpop.f32.mrf.mxu1 }
  0xcc   : > { %v4031_v4 = vpop.f32.mrf.mxu2 }
  0xcd   : > { %v4033_v5 = vpop.f32.mrf.mxu0 }
  0xce   : > { %v4036_v7 = vpop.f32.mrf.mxu1 }
  0xd0   : > { %3447 = vmatmul.msk.bf16.gmra.mxu0 %vm1168_vm2, %v3580_v3  ;;  %3544 = vmatmul.msk.bf16.gmra.mxu3 %vm1168_vm2, %v3677_v31  ;;  %v4113_v3 = vpop.f32.mrf.mxu3 }
  0xd1   : > { %3514 = vmatmul.msk.bf16.gmra.mxu2 %vm1168_vm2, %v3647_v6  ;;  %3487 = vmatmul.msk.bf16.gmra.mxu1 %vm1168_vm2, %v3620_v8  ;;  %5200 = vst [vmem:[#allocation11_spill] sm:$0xff] %v4113_v3  ;;  %v3624_v6 = vld [vmem:[%s3910_s19 + $0x1b8] sm:$0xff]  ;;  %v4121_v8 = vld [vmem:[%s5187_s2] ss:$0 sm:$0xff] }
  0xd4   : > { %v4042_v9 = vpop.f32.mrf.mxu2 }
  0xd5   : > { %v4044_v10 = vpop.f32.mrf.mxu0 }
  0xd6   : > { %v4047_v12 = vpop.f32.mrf.mxu1 }
  0xd8   : > { %v4131_v31 = vpop.f32.mrf.mxu3 }
  0xd9   : > { %5202 = vst [vmem:[#allocation13_spill] sm:$0xff] %v4131_v31  ;;  %v3628_v31 = vld [vmem:[%s3910_s19 + $0x1d8] sm:$0xff] }
  0xdc   : > { %v4051_v14 = vpop.f32.mrf.mxu2 }
  0xdd   : > { %v4053_v15 = vpop.f32.mrf.mxu0 }
  0xde   : > { %v4056_v17 = vpop.f32.mrf.mxu1 }
  0xe0   : > { %3448 = vmatmul.msk.bf16.gmra.mxu0 %vm1168_vm2, %v3581_v13  ;;  %3545 = vmatmul.msk.bf16.gmra.mxu3 %vm1168_vm2, %v3678_v47 }
  0xe1   : > { %3515 = vmatmul.msk.bf16.gmra.mxu2 %vm1168_vm2, %v3648_v16  ;;  %3488 = vmatmul.msk.bf16.gmra.mxu1 %vm1168_vm2, %v3621_v18 }
  0xe4   : > { %v4062_v19 = vpop.f32.mrf.mxu2 }
  0xe5   : > { %v4064_v20 = vpop.f32.mrf.mxu0 }
  0xe6   : > { %v4067_v22 = vpop.f32.mrf.mxu1 }
  0xec   : > { %v4071_v24 = vpop.f32.mrf.mxu2 }
  0xed   : > { %v1594_v25 = vpop.f32.mrf.mxu0 }
  0xee   : > { %v4074_v27 = vpop.f32.mrf.mxu1 }
  0xf0   : > { %3449 = vmatmul.msk.bf16.gmra.mxu0 %vm1168_vm2, %v3582_v23  ;;  %3546 = vmatmul.msk.bf16.gmra.mxu3 %vm1168_vm2, %v3679_v21  ;;  %v3625_v21 = vld [vmem:[%s3910_s19 + $0x1c0] sm:$0xff] }
  0xf1   : > { %3516 = vmatmul.msk.bf16.gmra.mxu2 %vm1168_vm2, %v3649_v26  ;;  %3489 = vmatmul.msk.bf16.gmra.mxu1 %vm1168_vm2, %v3622_v28 }
  0xf4   : > { %v4080_v29 = vpop.f32.mrf.mxu2 }
  0xf5   : > { %5194 = vst [vmem:[#allocation5_spill] sm:$0xff] %v4080_v29  ;;  %v1596_v30 = vpop.f32.mrf.mxu0  ;;  %v3629_v29 = vld [vmem:[%s3910_s19 + $0x1e0] sm:$0xff] }
  0xf6   : > { %v4083_v32 = vpop.f32.mrf.mxu1 }
  0xfc   : > { %v4087_v34 = vpop.f32.mrf.mxu2 }
  0xfd   : > { %5195 = vst [vmem:[#allocation6_spill] sm:$0xff] %v4087_v34  ;;  %v1599_v35 = vpop.f32.mrf.mxu0  ;;  %v3684_v34 = vld [vmem:[%s3910_s19 + $0x398] sm:$0xff] }
  0xfe   : > { %v4090_v37 = vpop.f32.mrf.mxu1 }
 0x100   : > { %3450 = vmatmul.msk.bf16.gmra.mxu0 %vm1168_vm2, %v3583_v33  ;;  %v1600_v33 = vadd.f32 %v4121_v8, %v1599_v35  ;;  %v1592_v35 = vadd.f32 %v4121_v8, %v4064_v20  ;;  %v1587_v20 = vadd.f32 %v4121_v8, %v4044_v10 }
 0x101   : > { %3517 = vmatmul.msk.bf16.gmra.mxu2 %vm1168_vm2, %v3650_v36  ;;  %3490 = vmatmul.msk.bf16.gmra.mxu1 %vm1168_vm2, %v3623_v40  ;;  %v1597_v40 = vadd.f32 %v4121_v8, %v1596_v30 }
 0x102   : > { %v2216_v10 = vmax.f32 %v1587_v20, 0.0  ;;  %v1575_v20 = vadd.f32 %v4121_v8, %v3993_v49  ;;  %v1570_v49 = vadd.f32 %v4121_v8, %v3973_v39 }
 0x103   : > { %v2220_v30 = vmax.f32 %v1597_v40, 0.0  ;;  %v1585_v40 = vadd.f32 %v4121_v8, %v4033_v5 }
 0x104   : > { %v4098_v42 = vpop.f32.mrf.mxu2 }
 0x105   : > { %5197 = vst [vmem:[#allocation8_spill] sm:$0xff] %v4098_v42  ;;  %v1601_v45 = vpop.f32.mrf.mxu0  ;;  %v2215_v5 = vmax.f32 %v1585_v40, 0.0  ;;  %v1572_v40 = vadd.f32 %v4121_v8, %v3984_v44 }
 0x106   : > { %v4101_v50 = vpop.f32.mrf.mxu1  ;;  %v1602_v26 = vadd.f32 %v4121_v8, %v1601_v45  ;;  %v3652_v45 = vld [vmem:[%s3910_s19 + $0x298] sm:$0xff] }
 0x107   : > { %v2210_v44 = vmax.f32 %v1572_v40, 0.0 }
 0x108   : > { %v2222_v47 = vmax.f32 %v1602_v26, 0.0 }
 0x10c   : > { %v4107_v57 = vpop.f32.mrf.mxu2 }
 0x10d   : > { %5199 = vst [vmem:[#allocation10_spill] sm:$0xff] %v4107_v57  ;;  %v1604_v60 = vpop.f32.mrf.mxu0 }
 0x10e   : > { %v4110_v1 = vpop.f32.mrf.mxu1  ;;  %v1605_v16 = vadd.f32 %v4121_v8, %v1604_v60 }
 0x110   : > { %3451 = vmatmul.msk.bf16.gmra.mxu0 %vm1168_vm2, %v3584_v55  ;;  %v2223_v36 = vmax.f32 %v1605_v16, 0.0  ;;  %v3585_v55 = vld [vmem:[%s3910_s19 + $0x80] sm:$0xff]  ;;  %v4148_v16 = vpop.f32.mrf.mxu3 }
 0x111   : > { %3518 = vmatmul.msk.bf16.gmra.mxu2 %vm1168_vm2, %v3651_v62  ;;  %3491 = vmatmul.msk.bf16.gmra.mxu1 %vm1168_vm2, %v3624_v6  ;;  %v1595_v6 = vadd.f32 %v4121_v8, %v1594_v25  ;;  %5205 = vst [vmem:[#allocation16_spill] sm:$0xff] %v4148_v16  ;;  %v1590_v25 = vadd.f32 %v4121_v8, %v4053_v15  ;;  %v3680_v15 = vld [vmem:[%s3910_s19 + $0x378] sm:$0xff] }
 0x113   : > { %v2219_v26 = vmax.f32 %v1595_v6, 0.0 }
 0x114   : > { %v4123_v11 = vpop.f32.mrf.mxu2 }
 0x115   : > { %5201 = vst [vmem:[#allocation12_spill] sm:$0xff] %v4123_v11  ;;  %v1606_v13 = vpop.f32.mrf.mxu0 }
 0x116   : > { %v1607_v18 = vadd.f32 %v4121_v8, %v1606_v13  ;;  %v4128_v23 = vpop.f32.mrf.mxu1  ;;  %v2221_v13 = vmax.f32 %v1600_v33, 0.0 }
 0x118   : > { %v2224_v28 = vmax.f32 %v1607_v18, 0.0  ;;  %v4168_v6 = vpop.f32.mrf.mxu3  ;;  %3547 = vmatmul.msk.bf16.gmra.mxu3 %vm1168_vm2, %v3680_v15  ;;  %v3626_v15 = vld [vmem:[%s3910_s19 + $0x1c8] sm:$0xff] }
 0x119   : > { %5208 = vst [vmem:[#allocation19_spill] sm:$0xff] %v4168_v6  ;;  %v3683_v6 = vld [vmem:[%s3910_s19 + $0x390] sm:$0xff] }
 0x11a   : > { %2481 = vmatpush.msrb.mxu1 %v2224_v28  ;;  %v2218_v28 = vmax.f32 %v1592_v35, 0.0  ;;  %v1577_v35 = vadd.f32 %v4121_v8, %v4004_v54 }
 0x11c   : > { %2482 = vmatpush.msrb.mxu1 %v2223_v36  ;;  %v4137_v60 = vpop.f32.mrf.mxu2  ;;  %v2212_v54 = vmax.f32 %v1577_v35, 0.0  ;;  %v3681_v35 = vld [vmem:[%s3910_s19 + $0x380] sm:$0xff] }
 0x11d   : > { %5203 = vst [vmem:[#allocation14_spill] sm:$0xff] %v4137_v60  ;;  %v4139_v62 = vpop.f32.mrf.mxu0 }
 0x11e   : > { %2483 = vmatpush.msrb.mxu1 %v2222_v47  ;;  %v4143_v18 = vpop.f32.mrf.mxu1  ;;  %v2217_v47 = vmax.f32 %v1590_v25, 0.0 }
 0x11f   : > { %5204 = vst [vmem:[#allocation15_spill] sm:$0xff] %v4143_v18 }
 0x120   : > { %3452 = vmatmul.msk.bf16.gmra.mxu0 %vm1168_vm2, %v3585_v55  ;;  %2484 = vmatpush.msrb.mxu1 %v2221_v13  ;;  %v1580_v13 = vadd.f32 %v4121_v8, %v4013_v59 }
 0x121   : > { %3519 = vmatmul.msk.bf16.gmra.mxu2 %vm1168_vm2, %v3652_v45  ;;  %3492 = vmatmul.msk.bf16.gmra.mxu1 %vm1168_vm2, %v3625_v21  ;;  %v1582_v45 = vadd.f32 %v4121_v8, %v4024_v0  ;;  %v3586_v21 = vld [vmem:[%s3910_s19 + $0x88] sm:$0xff] }
 0x122   : > { %2485 = vmatpush.msrb.mxu1 %v2220_v30 }
 0x123   : > { %v2214_v30 = vmax.f32 %v1582_v45, 0.0  ;;  %v2211_v45 = vmax.f32 %v1575_v20, 0.0 }
 0x124   : > { %2486 = vmatpush.msrb.mxu1 %v2219_v26  ;;  %v4157_v33 = vpop.f32.mrf.mxu2  ;;  %v3653_v26 = vld [vmem:[%s3910_s19 + $0x2a0] sm:$0xff] }
 0x125   : > { %5206 = vst [vmem:[#allocation17_spill] sm:$0xff] %v4157_v33  ;;  %v4159_v36 = vpop.f32.mrf.mxu0  ;;  %v3630_v33 = vld [vmem:[%s3910_s19 + $0x1e8] sm:$0xff] }
 0x126   : > { %2487 = vmatpush.msrb.mxu1 %v2218_v28  ;;  %v4164_v55 = vpop.f32.mrf.mxu1  ;;  %v2213_v28 = vmax.f32 %v1580_v13, 0.0 }
 0x127   : > { %5207 = vst [vmem:[#allocation18_spill] sm:$0xff] %v4164_v55  ;;  %v3687_v55 = vld [vmem:[%s3910_s19 + $0x3b0] sm:$0xff] }
 0x128   : > { %2488 = vmatpush.msrb.mxu1 %v2217_v47  ;;  %v4188_v47 = vpop.f32.mrf.mxu3 }
 0x129   : > { %5211 = vst [vmem:[#allocation22_spill] sm:$0xff] %v4188_v47 }
 0x12a   : > { %2489 = vmatpush.msrb.mxu1 %v2216_v10 }
 0x12c   : > { %2490 = vmatpush.msrb.mxu1 %v2215_v5  ;;  %v4176_v25 = vpop.f32.mrf.mxu2  ;;  %v2209_v5 = vmax.f32 %v1570_v49, 0.0 }
 0x12d   : > { %5209 = vst [vmem:[#allocation20_spill] sm:$0xff] %v4176_v25  ;;  %v4178_v0 = vpop.f32.mrf.mxu0  ;;  %v3685_v25 = vld [vmem:[%s3910_s19 + $0x3a0] sm:$0xff] }
 0x12e   : > { %2491 = vmatpush.msrb.mxu1 %v2214_v30  ;;  %v4183_v59 = vpop.f32.mrf.mxu1 }
 0x12f   : > { %5210 = vst [vmem:[#allocation21_spill] sm:$0xff] %v4183_v59 }
 0x130   : > { %3453 = vmatmul.msk.bf16.gmra.mxu0 %vm1168_vm2, %v3586_v21  ;;  %2492 = vmatpush.msrb.mxu1 %v2213_v28  ;;  %v4202_v39 = vpop.f32.mrf.mxu3  ;;  %v3587_v21 = vld [vmem:[%s3910_s19 + $0x90] sm:$0xff]  ;;  %v3654_v28 = vld [vmem:[%s3910_s19 + $0x2a8] sm:$0xff] }
 0x131   : > { %3520 = vmatmul.msk.bf16.gmra.mxu2 %vm1168_vm2, %v3653_v26  ;;  %3493 = vmatmul.msk.bf16.gmra.mxu1 %vm1168_vm2, %v3626_v15  ;;  %5214 = vst [vmem:[#allocation25_spill] sm:$0xff] %v4202_v39  ;;  %v3627_v15 = vld [vmem:[%s3910_s19 + $0x1d0] sm:$0xff] }
 0x132   : > { %2493 = vmatpush.msrb.mxu1 %v2212_v54  ;;  %3548 = vmatmul.msk.bf16.gmra.mxu3 %vm1168_vm2, %v3681_v35 }
 0x134   : > { %2494 = vmatpush.msrb.mxu1 %v2211_v45  ;;  %v4195_v10 = vpop.f32.mrf.mxu2 }
 0x135   : > { %5212 = vst [vmem:[#allocation23_spill] sm:$0xff] %v4195_v10  ;;  %v4197_v13 = vpop.f32.mrf.mxu0 }
 0x136   : > { %2495 = vmatpush.msrb.mxu1 %v2210_v44  ;;  %v4200_v30 = vpop.f32.mrf.mxu1  ;;  %v3682_v44 = vld [vmem:[%s3910_s19 + $0x388] sm:$0xff] }
 0x137   : > { %5213 = vst [vmem:[#allocation24_spill] sm:$0xff] %v4200_v30 }
 0x138   : > { %2496 = vmatpush.msrb.mxu1 %v2209_v5  ;;  %v4214_v54 = vpop.f32.mrf.mxu3 }
 0x139   : > { %5217 = vst [vmem:[#allocation28_spill] sm:$0xff] %v4214_v54 }
 0x13c   : > { %v4206_v26 = vpop.f32.mrf.mxu2 }
 0x13d   : > { %5215 = vst [vmem:[#allocation26_spill] sm:$0xff] %v4206_v26  ;;  %v4208_v20 = vpop.f32.mrf.mxu0 }
 0x13e   : > { %v4211_v40 = vpop.f32.mrf.mxu1 }
 0x13f   : > { %5216 = vst [vmem:[#allocation27_spill] sm:$0xff] %v4211_v40 }
 0x140   : > { %3454 = vmatmul.msk.bf16.gmra.mxu0 %vm1168_vm2, %v3587_v21  ;;  %v4226_v35 = vpop.f32.mrf.mxu3  ;;  %v3588_v21 = vld [vmem:[%s3910_s19 + $0x98] sm:$0xff] }
 0x141   : > { %3521 = vmatmul.msk.bf16.gmra.mxu2 %vm1168_vm2, %v3654_v28  ;;  %3494 = vmatmul.msk.bf16.gmra.mxu1 %vm1168_vm2, %v3627_v15  ;;  %5220 = vst [vmem:[#allocation31_spill] sm:$0xff] %v4226_v35  ;;  %v3655_v28 = vld [vmem:[%s3910_s19 + $0x2b0] sm:$0xff] }
 0x142   : > { %3549 = vmatmul.msk.bf16.gmra.mxu3 %vm1168_vm2, %v3682_v44 }
 0x144   : > { %v4219_v49 = vpop.f32.mrf.mxu2 }
 0x145   : > { %5218 = vst [vmem:[#allocation29_spill] sm:$0xff] %v4219_v49  ;;  %v4221_v45 = vpop.f32.mrf.mxu0 }
 0x146   : > { %v4224_v5 = vpop.f32.mrf.mxu1 }
 0x147   : > { %5219 = vst [vmem:[#allocation30_spill] sm:$0xff] %v4224_v5 }
 0x148   : > { %v4238_v3 = vpop.f32.mrf.mxu3 }
 0x149   : > { %5223 = vst [vmem:[#allocation34_spill] sm:$0xff] %v4238_v3 }
 0x14c   : > { %v4230_v38 = vpop.f32.mrf.mxu2 }
 0x14d   : > { %5221 = vst [vmem:[#allocation32_spill] sm:$0xff] %v4230_v38  ;;  %v4232_v52 = vpop.f32.mrf.mxu0  ;;  %v3658_v38 = vld [vmem:[%s3910_s19 + $0x2c8] sm:$0xff] }
 0x14e   : > { %v4235_v15 = vpop.f32.mrf.mxu1 }
 0x14f   : > { %5222 = vst [vmem:[#allocation33_spill] sm:$0xff] %v4235_v15 }
 0x150   : > { %3455 = vmatmul.msk.bf16.gmra.mxu0 %vm1168_vm2, %v3588_v21  ;;  %v4250_v39 = vpop.f32.mrf.mxu3  ;;  %v3589_v21 = vld [vmem:[%s3910_s19 + $0xa0] sm:$0xff] }
 0x151   : > { %3522 = vmatmul.msk.bf16.gmra.mxu2 %vm1168_vm2, %v3655_v28  ;;  %3495 = vmatmul.msk.bf16.gmra.mxu1 %vm1168_vm2, %v3628_v31  ;;  %5226 = vst [vmem:[#allocation37_spill] sm:$0xff] %v4250_v39  ;;  %v3656_v28 = vld [vmem:[%s3910_s19 + $0x2b8] sm:$0xff] }
 0x152   : > { %3550 = vmatmul.msk.bf16.gmra.mxu3 %vm1168_vm2, %v3683_v6 }
 0x154   : > { %v4243_v44 = vpop.f32.mrf.mxu2 }
 0x155   : > { %5224 = vst [vmem:[#allocation35_spill] sm:$0xff] %v4243_v44  ;;  %v4245_v16 = vpop.f32.mrf.mxu0  ;;  %v3686_v44 = vld [vmem:[%s3910_s19 + $0x3a8] sm:$0xff] }
 0x156   : > { %v4248_v47 = vpop.f32.mrf.mxu1 }
 0x157   : > { %5225 = vst [vmem:[#allocation36_spill] sm:$0xff] %v4248_v47 }
 0x158   : > { %v4262_v3 = vpop.f32.mrf.mxu3 }
 0x159   : > { %5229 = vst [vmem:[#allocation40_spill] sm:$0xff] %v4262_v3 }
 0x15c   : > { %v4254_v54 = vpop.f32.mrf.mxu2 }
 0x15d   : > { %5227 = vst [vmem:[#allocation38_spill] sm:$0xff] %v4254_v54  ;;  %v4256_v35 = vpop.f32.mrf.mxu0 }
 0x15e   : > { %v4259_v31 = vpop.f32.mrf.mxu1 }
 0x15f   : > { %5228 = vst [vmem:[#allocation39_spill] sm:$0xff] %v4259_v31 }
 0x160   : > { %3456 = vmatmul.msk.bf16.gmra.mxu0 %vm1168_vm2, %v3589_v21  ;;  %v4274_v57 = vpop.f32.mrf.mxu3  ;;  %v3590_v21 = vld [vmem:[%s3910_s19 + $0xa8] sm:$0xff] }
 0x161   : > { %3523 = vmatmul.msk.bf16.gmra.mxu2 %vm1168_vm2, %v3656_v28  ;;  %3496 = vmatmul.msk.bf16.gmra.mxu1 %vm1168_vm2, %v3629_v29  ;;  %5232 = vst [vmem:[#allocation43_spill] sm:$0xff] %v4274_v57  ;;  %v3657_v28 = vld [vmem:[%s3910_s19 + $0x2c0] sm:$0xff] }
 0x162   : > { %3551 = vmatmul.msk.bf16.gmra.mxu3 %vm1168_vm2, %v3684_v34 }
 0x164   : > { %v4267_v6 = vpop.f32.mrf.mxu2 }
 0x165   : > { %5230 = vst [vmem:[#allocation41_spill] sm:$0xff] %v4267_v6  ;;  %v4269_v39 = vpop.f32.mrf.mxu0 }
 0x166   : > { %v4272_v42 = vpop.f32.mrf.mxu1 }
 0x167   : > { %5231 = vst [vmem:[#allocation42_spill] sm:$0xff] %v4272_v42 }
 0x168   : > { %v4284_v60 = vpop.f32.mrf.mxu3 }
 0x169   : > { %5235 = vst [vmem:[#allocation46_spill] sm:$0xff] %v4284_v60 }
 0x16c   : > { %v4278_v3 = vpop.f32.mrf.mxu2 }
 0x16d   : > { %5233 = vst [vmem:[#allocation44_spill] sm:$0xff] %v4278_v3  ;;  %v1634_v11 = vpop.f32.mrf.mxu0  ;;  %v3659_v3 = vld [vmem:[%s3910_s19 + $0x2d0] sm:$0xff] }
 0x16e   : > { %v4281_v29 = vpop.f32.mrf.mxu1 }
 0x16f   : > { %5234 = vst [vmem:[#allocation45_spill] sm:$0xff] %v4281_v29  ;;  %v3695_v29 = vld [vmem:[%s3910_s19 + $0x3f0] sm:$0xff] }
 0x170   : > { %3457 = vmatmul.msk.bf16.gmra.mxu0 %vm1168_vm2, %v3590_v21  ;;  %v4294_v26 = vpop.f32.mrf.mxu3  ;;  %v3591_v21 = vld [vmem:[%s3910_s19 + $0xb0] sm:$0xff] }
 0x171   : > { %3524 = vmatmul.msk.bf16.gmra.mxu2 %vm1168_vm2, %v3657_v28  ;;  %3497 = vmatmul.msk.bf16.gmra.mxu1 %vm1168_vm2, %v3630_v33  ;;  %5238 = vst [vmem:[#allocation49_spill] sm:$0xff] %v4294_v26 }
 0x172   : > { %3552 = vmatmul.msk.bf16.gmra.mxu3 %vm1168_vm2, %v3685_v25 }
 0x174   : > { %v4289_v34 = vpop.f32.mrf.mxu2 }
 0x175   : > { %5236 = vst [vmem:[#allocation47_spill] sm:$0xff] %v4289_v34  ;;  %v1636_v57 = vpop.f32.mrf.mxu0  ;;  %v3631_v34 = vld [vmem:[%s3910_s19 + $0x1f0] sm:$0xff] }
 0x176   : > { %v4292_v10 = vpop.f32.mrf.mxu1 }
 0x177   : > { %5237 = vst [vmem:[#allocation48_spill] sm:$0xff] %v4292_v10 }
 0x178   : > { %v4304_v33 = vpop.f32.mrf.mxu3 }
 0x179   : > { %5241 = vst [vmem:[#allocation52_spill] sm:$0xff] %v4304_v33 }
 0x17c   : > { %v4298_v60 = vpop.f32.mrf.mxu2 }
 0x17d   : > { %5239 = vst [vmem:[#allocation50_spill] sm:$0xff] %v4298_v60  ;;  %v1639_v49 = vpop.f32.mrf.mxu0 }
 0x17e   : > { %v4301_v28 = vpop.f32.mrf.mxu1 }
 0x17f   : > { %5240 = vst [vmem:[#allocation51_spill] sm:$0xff] %v4301_v28 }
 0x180   : > { %3458 = vmatmul.msk.bf16.gmra.mxu0 %vm1168_vm2, %v3591_v21  ;;  %v4314_v54 = vpop.f32.mrf.mxu3  ;;  %v3592_v21 = vld [vmem:[%s3910_s19 + $0xb8] sm:$0xff] }
 0x181   : > { %3525 = vmatmul.msk.bf16.gmra.mxu2 %vm1168_vm2, %v3658_v38  ;;  %3498 = vmatmul.msk.bf16.gmra.mxu1 %vm1168_vm2, %v3631_v34  ;;  %5244 = vst [vmem:[#allocation55_spill] sm:$0xff] %v4314_v54  ;;  %v3632_v34 = vld [vmem:[%s3910_s19 + $0x1f8] sm:$0xff] }
 0x182   : > { %3553 = vmatmul.msk.bf16.gmra.mxu3 %vm1168_vm2, %v3686_v44 }
 0x184   : > { %v4309_v25 = vpop.f32.mrf.mxu2 }
 0x185   : > { %5242 = vst [vmem:[#allocation53_spill] sm:$0xff] %v4309_v25  ;;  %v1641_v26 = vpop.f32.mrf.mxu0 }
 0x186   : > { %v4312_v60 = vpop.f32.mrf.mxu1 }
 0x187   : > { %5243 = vst [vmem:[#allocation54_spill] sm:$0xff] %v4312_v60 }
 0x188   : > { %v4324_v38 = vpop.f32.mrf.mxu3 }
 0x189   : > { %5247 = vst [vmem:[#allocation58_spill] sm:$0xff] %v4324_v38 }
 0x18c   : > { %v4318_v6 = vpop.f32.mrf.mxu2 }
 0x18d   : > { %5245 = vst [vmem:[#allocation56_spill] sm:$0xff] %v4318_v6  ;;  %v1644_v33 = vpop.f32.mrf.mxu0 }
 0x18e   : > { %v4321_v18 = vpop.f32.mrf.mxu1  ;;  %v1645_v25 = vadd.f32 %v4121_v8, %v1644_v33 }
 0x18f   : > { %5246 = vst [vmem:[#allocation57_spill] sm:$0xff] %v4321_v18 }
 0x190   : > { %3459 = vmatmul.msk.bf16.gmra.mxu0 %vm1168_vm2, %v3592_v21  ;;  %v1642_v21 = vadd.f32 %v4121_v8, %v1641_v26  ;;  %v4337_v30 = vpop.f32.mrf.mxu3  ;;  %v3660_v26 = vld [vmem:[%s3910_s19 + $0x2d8] sm:$0xff] }
 0x191   : > { %3526 = vmatmul.msk.bf16.gmra.mxu2 %vm1168_vm2, %v3659_v3  ;;  %3499 = vmatmul.msk.bf16.gmra.mxu1 %vm1168_vm2, %v3632_v34  ;;  %5250 = vst [vmem:[#allocation61_spill] sm:$0xff] %v4337_v30  ;;  %v1640_v3 = vadd.f32 %v4121_v8, %v1639_v49  ;;  %v2239_v34 = vmax.f32 %v1645_v25, 0.0 }
 0x192   : > { %3554 = vmatmul.msk.bf16.gmra.mxu3 %vm1168_vm2, %v3687_v55  ;;  %v2238_v33 = vmax.f32 %v1642_v21, 0.0  ;;  %v1632_v55 = vadd.f32 %v4121_v8, %v4269_v39  ;;  %v1627_v39 = vadd.f32 %v4121_v8, %v4245_v16 }
 0x193   : > { %v2237_v30 = vmax.f32 %v1640_v3, 0.0 }
 0x194   : > { %v4329_v54 = vpop.f32.mrf.mxu2 }
 0x195   : > { %5248 = vst [vmem:[#allocation59_spill] sm:$0xff] %v4329_v54  ;;  %v1646_v44 = vpop.f32.mrf.mxu0  ;;  %v1637_v54 = vadd.f32 %v4121_v8, %v1636_v57 }
 0x196   : > { %v1647_v6 = vadd.f32 %v4121_v8, %v1646_v44  ;;  %v4334_v59 = vpop.f32.mrf.mxu1  ;;  %v3593_v44 = vld [vmem:[%s3910_s19 + $0xc0] sm:$0xff] }
 0x197   : > { %5249 = vst [vmem:[#allocation60_spill] sm:$0xff] %v4334_v59  ;;  %v2236_v57 = vmax.f32 %v1637_v54, 0.0  ;;  %v3601_v59 = vld [vmem:[%s3910_s19 + $0x100] sm:$0xff] }
 0x198   : > { %v2240_v38 = vmax.f32 %v1647_v6, 0.0  ;;  %v1635_v6 = vadd.f32 %v4121_v8, %v1634_v11  ;;  %v4352_v49 = vpop.f32.mrf.mxu3  ;;  %v1630_v11 = vadd.f32 %v4121_v8, %v4256_v35  ;;  %v3688_v35 = vld [vmem:[%s3910_s19 + $0x3b8] sm:$0xff] }
 0x199   : > { %5252 = vst [vmem:[#allocation63_spill] sm:$0xff] %v4352_v49  ;;  %v3596_v49 = vld [vmem:[%s3910_s19 + $0xd8] sm:$0xff] }
 0x19a   : > { %2501 = vmatpush.msrb.mxu2 %v2240_v38  ;;  %v3633_v38 = vld [vmem:[%s3910_s19 + $0x200] sm:$0xff]  ;;  %v2235_v21 = vmax.f32 %v1635_v6, 0.0 }
 0x19c   : > { %2502 = vmatpush.msrb.mxu2 %v2239_v34  ;;  %v4343_v40 = vpop.f32.mrf.mxu2  ;;  %v1625_v34 = vadd.f32 %v4121_v8, %v4232_v52 }
 0x19d   : > { %5251 = vst [vmem:[#allocation62_spill] sm:$0xff] %v4343_v40  ;;  %v4345_v5 = vpop.f32.mrf.mxu0 }
 0x19e   : > { %2503 = vmatpush.msrb.mxu2 %v2238_v33  ;;  %v4354_v25 = vpop.f32.mrf.mxu1  ;;  %v2233_v33 = vmax.f32 %v1630_v11, 0.0  ;;  %v2231_v52 = vmax.f32 %v1625_v34, 0.0 }
 0x19f   : > { %5253 = vst [vmem:[#allocation64_spill] sm:$0xff] %v4354_v25 }
 0x1a0   : > { %3460 = vmatmul.msk.bf16.gmra.mxu0 %vm1168_vm2, %v3593_v44  ;;  %2504 = vmatpush.msrb.mxu2 %v2237_v30  ;;  %v2234_v30 = vmax.f32 %v1632_v55, 0.0  ;;  %v1622_v44 = vadd.f32 %v4121_v8, %v4221_v45  ;;  %v4372_v16 = vpop.f32.mrf.mxu3  ;;  %v1620_v55 = vadd.f32 %v4121_v8, %v4208_v20  ;;  %v3594_v45 = vld [vmem:[%s3910_s19 + $0xc8] sm:$0xff]  ;;  %v1612_v20 = vadd.f32 %v4121_v8, %v4159_v36 }
 0x1a1   : > { %3527 = vmatmul.msk.bf16.gmra.mxu2 %vm1168_vm2, %v3660_v26  ;;  %3500 = vmatmul.msk.bf16.gmra.mxu1 %vm1168_vm2, %v3633_v38  ;;  %v2232_v26 = vmax.f32 %v1627_v39, 0.0  ;;  %5255 = vst [vmem:[#allocation66_spill] sm:$0xff] %v4372_v16  ;;  %v3661_v39 = vld [vmem:[%s3910_s19 + $0x2e0] sm:$0xff] }
 0x1a2   : > { %2505 = vmatpush.msrb.mxu2 %v2236_v57  ;;  %3555 = vmatmul.msk.bf16.gmra.mxu3 %vm1168_vm2, %v3688_v35  ;;  %v1617_v57 = vadd.f32 %v4121_v8, %v4197_v13  ;;  %v2230_v38 = vmax.f32 %v1622_v44, 0.0  ;;  %v3634_v44 = vld [vmem:[%s3910_s19 + $0x208] sm:$0xff]  ;;  %v2226_v36 = vmax.f32 %v1612_v20, 0.0 }
 0x1a3   : > { %v3662_v20 = vld [vmem:[%s3910_s19 + $0x2e8] sm:$0xff] }
 0x1a4   : > { %2506 = vmatpush.msrb.mxu2 %v2235_v21  ;;  %v4363_v54 = vpop.f32.mrf.mxu2  ;;  %v2228_v13 = vmax.f32 %v1617_v57, 0.0 }
 0x1a5   : > { %5254 = vst [vmem:[#allocation65_spill] sm:$0xff] %v4363_v54  ;;  %v4365_v3 = vpop.f32.mrf.mxu0 }
 0x1a6   : > { %2507 = vmatpush.msrb.mxu2 %v2234_v30  ;;  %v4375_v6 = vpop.f32.mrf.mxu1  ;;  %v1615_v30 = vadd.f32 %v4121_v8, %v4178_v0  ;;  %v1610_v0 = vadd.f32 %v4121_v8, %v4139_v62 }
 0x1a7   : > { %5256 = vst [vmem:[#allocation67_spill] sm:$0xff] %v4375_v6 }
 0x1a8   : > { %2508 = vmatpush.msrb.mxu2 %v2233_v33  ;;  %v2229_v33 = vmax.f32 %v1620_v55, 0.0  ;;  %v4392_v34 = vpop.f32.mrf.mxu3  ;;  %v2225_v57 = vmax.f32 %v1610_v0, 0.0  ;;  %v3635_v0 = vld [vmem:[%s3910_s19 + $0x210] sm:$0xff] }
 0x1a9   : > { %5258 = vst [vmem:[#allocation69_spill] sm:$0xff] %v4392_v34 }
 0x1aa   : > { %2509 = vmatpush.msrb.mxu2 %v2232_v26  ;;  %v2227_v26 = vmax.f32 %v1615_v30, 0.0 }
 0x1ac   : > { %2510 = vmatpush.msrb.mxu2 %v2231_v52  ;;  %v4382_v11 = vpop.f32.mrf.mxu2 }
 0x1ad   : > { %5257 = vst [vmem:[#allocation68_spill] sm:$0xff] %v4382_v11  ;;  %v4384_v21 = vpop.f32.mrf.mxu0 }
 0x1ae   : > { %2511 = vmatpush.msrb.mxu2 %v2230_v38  ;;  %v4394_v35 = vpop.f32.mrf.mxu1  ;;  %v3689_v38 = vld [vmem:[%s3910_s19 + $0x3c0] sm:$0xff] }
 0x1af   : > { %5259 = vst [vmem:[#allocation70_spill] sm:$0xff] %v4394_v35 }
 0x1b0   : > { %3461 = vmatmul.msk.bf16.gmra.mxu0 %vm1168_vm2, %v3594_v45  ;;  %2512 = vmatpush.msrb.mxu2 %v2229_v33  ;;  %v4406_v45 = vpop.f32.mrf.mxu3 }
 0x1b1   : > { %3528 = vmatmul.msk.bf16.gmra.mxu2 %vm1168_vm2, %v3661_v39  ;;  %3501 = vmatmul.msk.bf16.gmra.mxu1 %vm1168_vm2, %v3634_v44  ;;  %5261 = vst [vmem:[#allocation72_spill] sm:$0xff] %v4406_v45  ;;  %v3595_v39 = vld [vmem:[%s3910_s19 + $0xd0] sm:$0xff] }
 0x1b2   : > { %2513 = vmatpush.msrb.mxu2 %v2228_v13  ;;  %3556 = vmatmul.msk.bf16.gmra.mxu3 %vm1168_vm2, %v3689_v38 }
 0x1b4   : > { %2514 = vmatpush.msrb.mxu2 %v2227_v26  ;;  %v4401_v55 = vpop.f32.mrf.mxu2 }
 0x1b5   : > { %5260 = vst [vmem:[#allocation71_spill] sm:$0xff] %v4401_v55  ;;  %v4403_v52 = vpop.f32.mrf.mxu0  ;;  %v3664_v55 = vld [vmem:[%s3910_s19 + $0x2f8] sm:$0xff] }
 0x1b6   : > { %2515 = vmatpush.msrb.mxu2 %v2226_v36  ;;  %v4409_v62 = vpop.f32.mrf.mxu1 }
 0x1b7   : > { %5262 = vst [vmem:[#allocation73_spill] sm:$0xff] %v4409_v62 }
 0x1b8   : > { %2516 = vmatpush.msrb.mxu2 %v2225_v57  ;;  %v4418_v13 = vpop.f32.mrf.mxu3  ;;  %v3690_v57 = vld [vmem:[%s3910_s19 + $0x3c8] sm:$0xff] }
 0x1b9   : > { %5264 = vst [vmem:[#allocation75_spill] sm:$0xff] %v4418_v13 }
 0x1bc   : > { %v4412_v30 = vpop.f32.mrf.mxu2 }
 0x1bd   : > { %5263 = vst [vmem:[#allocation74_spill] sm:$0xff] %v4412_v30  ;;  %v4414_v33 = vpop.f32.mrf.mxu0 }
 0x1be   : > { %v4420_v44 = vpop.f32.mrf.mxu1 }
 0x1bf   : > { %5265 = vst [vmem:[#allocation76_spill] sm:$0xff] %v4420_v44 }
 0x1c0   : > { %3462 = vmatmul.msk.bf16.gmra.mxu0 %vm1168_vm2, %v3595_v39  ;;  %v4430_v38 = vpop.f32.mrf.mxu3 }
 0x1c1   : > { %3529 = vmatmul.msk.bf16.gmra.mxu2 %vm1168_vm2, %v3662_v20  ;;  %3502 = vmatmul.msk.bf16.gmra.mxu1 %vm1168_vm2, %v3635_v0  ;;  %5267 = vst [vmem:[#allocation78_spill] sm:$0xff] %v4430_v38  ;;  %v3663_v0 = vld [vmem:[%s3910_s19 + $0x2f0] sm:$0xff] }
 0x1c2   : > { %3557 = vmatmul.msk.bf16.gmra.mxu3 %vm1168_vm2, %v3690_v57  ;;  %v3691_v38 = vld [vmem:[%s3910_s19 + $0x3d0] sm:$0xff] }
 0x1c4   : > { %v4425_v26 = vpop.f32.mrf.mxu2 }
 0x1c5   : > { %5266 = vst [vmem:[#allocation77_spill] sm:$0xff] %v4425_v26  ;;  %v4427_v36 = vpop.f32.mrf.mxu0  ;;  %v3692_v26 = vld [vmem:[%s3910_s19 + $0x3d8] sm:$0xff] }
 0x1c6   : > { %v4433_v39 = vpop.f32.mrf.mxu1 }
 0x1c7   : > { %5268 = vst [vmem:[#allocation79_spill] sm:$0xff] %v4433_v39 }
 0x1c8   : > { %v4442_v34 = vpop.f32.mrf.mxu3 }
 0x1c9   : > { %5270 = vst [vmem:[#allocation81_spill] sm:$0xff] %v4442_v34 }
 0x1cc   : > { %v4436_v16 = vpop.f32.mrf.mxu2 }
 0x1cd   : > { %5269 = vst [vmem:[#allocation80_spill] sm:$0xff] %v4436_v16  ;;  %v4438_v20 = vpop.f32.mrf.mxu0 }
 0x1ce   : > { %v4444_v45 = vpop.f32.mrf.mxu1 }
 0x1cf   : > { %5271 = vst [vmem:[#allocation82_spill] sm:$0xff] %v4444_v45 }
 0x1d0   : > { %3463 = vmatmul.msk.bf16.gmra.mxu0 %vm1168_vm2, %v3596_v49  ;;  %v4452_v40 = vpop.f32.mrf.mxu3  ;;  %v3597_v49 = vld [vmem:[%s3910_s19 + $0xe0] sm:$0xff] }
 0x1d1   : > { %3530 = vmatmul.msk.bf16.gmra.mxu2 %vm1168_vm2, %v3663_v0  ;;  %5273 = vst [vmem:[#allocation84_spill] sm:$0xff] %v4452_v40 }
 0x1d2   : > { %3558 = vmatmul.msk.bf16.gmra.mxu3 %vm1168_vm2, %v3691_v38 }
 0x1d4   : > { %v4447_v13 = vpop.f32.mrf.mxu2 }
 0x1d5   : > { %5272 = vst [vmem:[#allocation83_spill] sm:$0xff] %v4447_v13  ;;  %v4449_v57 = vpop.f32.mrf.mxu0 }
 0x1d6   : > { %v4455_v54 = vpop.f32.mrf.mxu1 }
 0x1d7   : > { %5274 = vst [vmem:[#allocation85_spill] sm:$0xff] %v4455_v54  ;;  %v3694_v54 = vld [vmem:[%s3910_s19 + $0x3e8] sm:$0xff] }
 0x1d8   : > { %v4464_v0 = vpop.f32.mrf.mxu3 }
 0x1d9   : > { %5276 = vst [vmem:[#allocation87_spill] sm:$0xff] %v4464_v0 }
 0x1dc   : > { %v4458_v11 = vpop.f32.mrf.mxu2 }
 0x1dd   : > { %5275 = vst [vmem:[#allocation86_spill] sm:$0xff] %v4458_v11  ;;  %v4460_v34 = vpop.f32.mrf.mxu0  ;;  %v3598_v11 = vld [vmem:[%s3910_s19 + $0xe8] sm:$0xff] }
 0x1de   : > { %v4466_v30 = vpop.f32.mrf.mxu1 }
 0x1df   : > { %5277 = vst [vmem:[#allocation88_spill] sm:$0xff] %v4466_v30 }
 0x1e0   : > { %3464 = vmatmul.msk.bf16.gmra.mxu0 %vm1168_vm2, %v3597_v49  ;;  %v4472_v16 = vpop.f32.mrf.mxu3 }
 0x1e1   : > { %3531 = vmatmul.msk.bf16.gmra.mxu2 %vm1168_vm2, %v3664_v55  ;;  %5279 = vst [vmem:[#allocation90_spill] sm:$0xff] %v4472_v16  ;;  %v3693_v16 = vld [vmem:[%s3910_s19 + $0x3e0] sm:$0xff] }
 0x1e2   : > { %3559 = vmatmul.msk.bf16.gmra.mxu3 %vm1168_vm2, %v3692_v26  ;;  %v3599_v26 = vld [vmem:[%s3910_s19 + $0xf0] sm:$0xff] }
 0x1e4   : > { %v4469_v40 = vpop.f32.mrf.mxu2 }
 0x1e5   : > { %5278 = vst [vmem:[#allocation89_spill] sm:$0xff] %v4469_v40  ;;  %v1671_v38 = vpop.f32.mrf.mxu0 }
 0x1e6   : > { %v4475_v13 = vpop.f32.mrf.mxu1 }
 0x1e7   : > { %5280 = vst [vmem:[#allocation91_spill] sm:$0xff] %v4475_v13 }
 0x1e8   : > { %v4481_v25 = vpop.f32.mrf.mxu3 }
 0x1e9   : > { %5282 = vst [vmem:[#allocation93_spill] sm:$0xff] %v4481_v25 }
 0x1ec   : > { %v4478_v49 = vpop.f32.mrf.mxu2 }
 0x1ed   : > { %5281 = vst [vmem:[#allocation92_spill] sm:$0xff] %v4478_v49  ;;  %v1674_v0 = vpop.f32.mrf.mxu0 }
 0x1ee   : > { %v4483_v55 = vpop.f32.mrf.mxu1 }
 0x1ef   : > { %5283 = vst [vmem:[#allocation94_spill] sm:$0xff] %v4483_v55 }
 0x1f0   : > { %3465 = vmatmul.msk.bf16.gmra.mxu0 %vm1168_vm2, %v3598_v11  ;;  %v4488_v35 = vpop.f32.mrf.mxu3 }
 0x1f2   : > { %3560 = vmatmul.msk.bf16.gmra.mxu3 %vm1168_vm2, %v3693_v16  ;;  %v3600_v16 = vld [vmem:[%s3910_s19 + $0xf8] sm:$0xff] }
 0x1f4   : > { %v4485_v40 = vpop.f32.mrf.mxu2 }
 0x1f5   : > { %v1676_v6 = vpop.f32.mrf.mxu0 }
 0x1f6   : > { %v4494_v44 = vpop.f32.mrf.mxu1  ;;  %v1677_v18 = vadd.f32 %v4121_v8, %v1676_v6 }
 0x1f7   : > { %5284 = vst [vmem:[#allocation95_spill] sm:$0xff] %v4494_v44 }
 0x1f8   : > { %v4497_v11 = vpop.f32.mrf.mxu3 }
 0x1fc   : > { %v4492_v62 = vpop.f32.mrf.mxu2 }
 0x1fd   : > { %v1679_v49 = vpop.f32.mrf.mxu0 }
 0x1fe   : > { %v4502_v30 = vpop.f32.mrf.mxu1 }
 0x1ff   : > { %5285 = vst [vmem:[#allocation96_spill] sm:$0xff] %v4502_v30 }
 0x200   : > { %3466 = vmatmul.msk.bf16.gmra.mxu0 %vm1168_vm2, %v3599_v26  ;;  %v4504_v13 = vpop.f32.mrf.mxu3 }
 0x202   : > { %3561 = vmatmul.msk.bf16.gmra.mxu3 %vm1168_vm2, %v3694_v54 }
 0x204   : > { %v4499_v39 = vpop.f32.mrf.mxu2 }
 0x205   : > { %v1681_v45 = vpop.f32.mrf.mxu0 }
 0x206   : > { %v4513_v44 = vpop.f32.mrf.mxu1  ;;  %v1682_v54 = vadd.f32 %v4121_v8, %v1681_v45 }
 0x207   : > { %5286 = vst [vmem:[#allocation97_spill] sm:$0xff] %v4513_v44 }
 0x208   : > { %v4511_v26 = vpop.f32.mrf.mxu3 }
 0x20c   : > { %v4508_v55 = vpop.f32.mrf.mxu2 }
 0x20d   : > { %v1684_v15 = vpop.f32.mrf.mxu0 }
 0x20e   : > { %v1685_v30 = vadd.f32 %v4121_v8, %v1684_v15  ;;  %v4525_v44 = vpop.f32.mrf.mxu1  ;;  %v2254_v15 = vmax.f32 %v1682_v54, 0.0 }
 0x210   : > { %3467 = vmatmul.msk.bf16.gmra.mxu0 %vm1168_vm2, %v3600_v16  ;;  %v4521_v28 = vpop.f32.mrf.mxu3  ;;  %v1680_v16 = vadd.f32 %v4121_v8, %v1679_v49  ;;  %v2255_v60 = vmax.f32 %v1685_v30, 0.0  ;;  %v1667_v49 = vadd.f32 %v4121_v8, %v4449_v57 }
 0x212   : > { %3562 = vmatmul.msk.bf16.gmra.mxu3 %vm1168_vm2, %v3695_v29  ;;  %v2253_v45 = vmax.f32 %v1680_v16, 0.0  ;;  %v1672_v29 = vadd.f32 %v4121_v8, %v1671_v38  ;;  %v2248_v57 = vmax.f32 %v1667_v49, 0.0  ;;  %v1655_v49 = vadd.f32 %v4121_v8, %v4384_v21 }
 0x214   : > { %v4515_v47 = vpop.f32.mrf.mxu2 }
 0x215   : > { %v1686_v31 = vpop.f32.mrf.mxu0 }
 0x216   : > { %v1687_v42 = vadd.f32 %v4121_v8, %v1686_v31 }
 0x218   : > { %v2256_v10 = vmax.f32 %v1687_v42, 0.0  ;;  %v1675_v42 = vadd.f32 %v4121_v8, %v1674_v0  ;;  %v4536_v30 = vpop.f32.mrf.mxu3  ;;  %v2250_v0 = vmax.f32 %v1672_v29, 0.0 }
 0x21a   : > { %2521 = vmatpush.msrb.mxu3 %v2256_v10  ;;  %v2252_v10 = vmax.f32 %v1677_v18, 0.0  ;;  %v2251_v6 = vmax.f32 %v1675_v42, 0.0  ;;  %v1665_v18 = vadd.f32 %v4121_v8, %v4438_v20  ;;  %v1657_v20 = vadd.f32 %v4121_v8, %v4403_v52 }
 0x21c   : > { %2522 = vmatpush.msrb.mxu3 %v2255_v60  ;;  %v4529_v31 = vpop.f32.mrf.mxu2  ;;  %v1670_v60 = vadd.f32 %v4121_v8, %v4460_v34  ;;  %v3696_v34 = vld [vmem:[%s3910_s19 + $0x3f8] sm:$0xff]  ;;  %v2247_v29 = vmax.f32 %v1665_v18, 0.0  ;;  %v2244_v52 = vmax.f32 %v1657_v20, 0.0  ;;  %v1650_v18 = vadd.f32 %v4121_v8, %v4345_v5 }
 0x21d   : > { %v4531_v25 = vpop.f32.mrf.mxu0  ;;  %v1802_v5 = vadd.f32 %v4121_v8, %v4101_v50 }
 0x21e   : > { %2523 = vmatpush.msrb.mxu3 %v2254_v15  ;;  %v2249_v16 = vmax.f32 %v1670_v60, 0.0  ;;  %v1662_v15 = vadd.f32 %v4121_v8, %v4427_v36  ;;  %v3602_v60 = vld [vmem:[%s3910_s19 + $0x108] sm:$0xff] }
 0x21f   : > { %v2302_v50 = vmax.f32 %v1802_v5, 0.0 }
 0x220   : > { %3468 = vmatmul.msk.bf16.gmra.mxu0 %vm1168_vm2, %v3601_v59  ;;  %2524 = vmatpush.msrb.mxu3 %v2253_v45  ;;  %v4546_v59 = vpop.f32.mrf.mxu1  ;;  %v4553_v42 = vpop.f32.mrf.mxu3  ;;  %v1660_v45 = vadd.f32 %v4121_v8, %v4414_v33  ;;  %v1652_v33 = vadd.f32 %v4121_v8, %v4365_v3 }
 0x222   : > { %2525 = vmatpush.msrb.mxu3 %v2252_v10  ;;  %v2246_v10 = vmax.f32 %v1662_v15, 0.0  ;;  %v1807_v15 = vadd.f32 %v4121_v8, %v4128_v23  ;;  %v2242_v21 = vmax.f32 %v1652_v33, 0.0  ;;  %v2467_v23 = vld [vmem:[%s5188_s3 + $0x10] sm:$0xff] }
 0x223   : > { %3563 = vmatmul.msk.bf16.gmra.mxu3 %vm1168_vm2, %v3696_v34  ;;  %v2243_v34 = vmax.f32 %v1655_v49, 0.0  ;;  %v3603_v33 = vld [vmem:[%s3910_s19 + $0x110] sm:$0xff] }
 0x224   : > { %2526 = vmatpush.msrb.mxu3 %v2251_v6  ;;  %v4542_v54 = vpop.f32.mrf.mxu2  ;;  %v2304_v20 = vmax.f32 %v1807_v15, 0.0 }
 0x225   : > { %v4544_v38 = vpop.f32.mrf.mxu0 }
 0x226   : > { %2527 = vmatpush.msrb.mxu3 %v2250_v0  ;;  %v2245_v0 = vmax.f32 %v1660_v45, 0.0  ;;  %v1805_v45 = vadd.f32 %v4121_v8, %v4110_v1 }
 0x228   : > { %2528 = vmatpush.msrb.mxu3 %v2249_v16  ;;  %v4567_v16 = vpop.f32.mrf.mxu1  ;;  %v2303_v1 = vmax.f32 %v1805_v45, 0.0 }
 0x22a   : > { %2529 = vmatpush.msrb.mxu3 %v2248_v57 }
 0x22c   : > { %2530 = vmatpush.msrb.mxu3 %v2247_v29  ;;  %v4561_v6 = vpop.f32.mrf.mxu2  ;;  %v2241_v29 = vmax.f32 %v1650_v18, 0.0  ;;  %v1795_v18 = vadd.f32 %v4121_v8, %v4074_v27  ;;  %v1787_v27 = vadd.f32 %v4121_v8, %v4047_v12  ;;  %v1780_v12 = vadd.f32 %v4121_v8, %v4016_v61 }
 0x22d   : > { %v4563_v36 = vpop.f32.mrf.mxu0 }
 0x22e   : > { %2531 = vmatpush.msrb.mxu3 %v2246_v10  ;;  %v4587_v10 = vpop.f32.mrf.mxu3  ;;  %v2299_v45 = vmax.f32 %v1795_v18, 0.0  ;;  %v1777_v18 = vadd.f32 %v4121_v8, %v4007_v56  ;;  %v1770_v56 = vadd.f32 %v4121_v8, %v3976_v41  ;;  %v1922_v41 = vadd.f32 %v4121_v8, %v4051_v14 }
 0x230   : > { %3469 = vmatmul.msk.bf16.gmra.mxu0 %vm1168_vm2, %v3602_v60  ;;  %2532 = vmatpush.msrb.mxu3 %v2245_v0  ;;  %v1800_v60 = vadd.f32 %v4121_v8, %v4090_v37  ;;  %v4591_v49 = vpop.f32.mrf.mxu1  ;;  %v1797_v0 = vadd.f32 %v4121_v8, %v4083_v32  ;;  %v1792_v37 = vadd.f32 %v4121_v8, %v4067_v22  ;;  %v2350_v14 = vmax.f32 %v1922_v41, 0.0 }
 0x231   : > { %v1790_v32 = vadd.f32 %v4121_v8, %v4056_v17  ;;  %v1782_v17 = vadd.f32 %v4121_v8, %v4027_v2  ;;  %v1775_v2 = vadd.f32 %v4121_v8, %v3996_v51  ;;  %v1927_v51 = vadd.f32 %v4121_v8, %v4071_v24  ;;  %v2470_v24 = vld [vmem:[%s5188_s3 + $0x28] sm:$0xff] }
 0x232   : > { %2533 = vmatpush.msrb.mxu3 %v2244_v52  ;;  %v2298_v5 = vmax.f32 %v1792_v37, 0.0  ;;  %v1907_v41 = vadd.f32 %v4121_v8, %v3991_v48 }
 0x234   : > { %2534 = vmatpush.msrb.mxu3 %v2243_v34  ;;  %v4576_v57 = vpop.f32.mrf.mxu2  ;;  %v2301_v34 = vmax.f32 %v1800_v60, 0.0  ;;  %v2297_v60 = vmax.f32 %v1790_v32, 0.0  ;;  %v2344_v48 = vmax.f32 %v1907_v41, 0.0 }
 0x235   : > { %v4580_v3 = vpop.f32.mrf.mxu0 }
 0x236   : > { %2535 = vmatpush.msrb.mxu3 %v2242_v21  ;;  %v2300_v21 = vmax.f32 %v1797_v0, 0.0  ;;  %v2296_v0 = vmax.f32 %v1787_v27, 0.0  ;;  %v2292_v27 = vmax.f32 %v1777_v18, 0.0 }
 0x238   : > { %2536 = vmatpush.msrb.mxu3 %v2241_v29  ;;  %v4607_v29 = vpop.f32.mrf.mxu3 }
 0x239   : > { %2537 = vmatmul.f32.vlgmr.msrb.gmra.mxu3 %v2467_v23  ;;  %v1785_v23 = vadd.f32 %v4121_v8, %v4036_v7  ;;  %v2294_v7 = vmax.f32 %v1782_v17, 0.0  ;;  %v1925_v17 = vadd.f32 %v4121_v8, %v4062_v19  ;;  %v1920_v19 = vadd.f32 %v4121_v8, %v4042_v9 }
 0x23a   : > { %2581 = vmatpush.msra.mxu3 %v2304_v20  ;;  %v4611_v20 = vpop.f32.mrf.mxu1  ;;  %v1912_v9 = vadd.f32 %v4121_v8, %v4011_v58  ;;  %v1905_v58 = vadd.f32 %v4121_v8, %v3982_v43 }
 0x23c   : > { %2582 = vmatpush.msra.mxu3 %v2303_v1  ;;  %v4596_v52 = vpop.f32.mrf.mxu2 }
 0x23d   : > { %v4600_v15 = vpop.f32.mrf.mxu0 }
 0x23e   : > { %2583 = vmatpush.msra.mxu3 %v2302_v50  ;;  %v2295_v50 = vmax.f32 %v1785_v23, 0.0 }
 0x240   : > { %2584 = vmatpush.msra.mxu3 %v2301_v34  ;;  %3470 = vmatmul.msk.bf16.gmra.mxu0 %vm1168_vm2, %v3603_v33  ;;  %v4623_v33 = vpop.f32.mrf.mxu3  ;;  %v3604_v34 = vld [vmem:[%s3910_s19 + $0x118] sm:$0xff] }
 0x242   : > { %2585 = vmatpush.msra.mxu3 %v2300_v21  ;;  %v2293_v21 = vmax.f32 %v1780_v12, 0.0  ;;  %v1896_v61 = vpop.f32.mrf.mxu1 }
 0x244   : > { %2586 = vmatpush.msra.mxu3 %v2299_v45  ;;  %v4613_v22 = vpop.f32.mrf.mxu2  ;;  %v1772_v45 = vadd.f32 %v4121_v8, %v3987_v46 }
 0x245   : > { %v4617_v1 = vpop.f32.mrf.mxu0 }
 0x246   : > { %2587 = vmatpush.msra.mxu3 %v2298_v5  ;;  %v2291_v5 = vmax.f32 %v1775_v2, 0.0  ;;  %v1917_v2 = vadd.f32 %v4121_v8, %v4031_v4  ;;  %v1910_v4 = vadd.f32 %v4121_v8, %v4002_v53  ;;  %v4681_v53 = vld [vmem:[%s5187_s2] ss:$0 sm:$0xff] }
 0x247   : > { %v1897_v43 = vadd.f32 %v4681_v53, %v1896_v61  ;;  %v1890_v61 = vadd.f32 %v4681_v53, %v4567_v16 }
 0x248   : > { %2588 = vmatpush.msra.mxu3 %v2297_v60  ;;  %v4639_v23 = vpop.f32.mrf.mxu3  ;;  %v2290_v60 = vmax.f32 %v1772_v45, 0.0  ;;  %v2349_v45 = vmax.f32 %v1920_v19, 0.0 }
 0x24a   : > { %2589 = vmatpush.msra.mxu3 %v2296_v0  ;;  %v2289_v0 = vmax.f32 %v1770_v56, 0.0  ;;  %v1899_v18 = vpop.f32.mrf.mxu1 }
 0x24c   : > { %2590 = vmatpush.msra.mxu3 %v2295_v50  ;;  %v4628_v37 = vpop.f32.mrf.mxu2  ;;  %v2352_v50 = vmax.f32 %v1927_v51, 0.0  ;;  %v2348_v51 = vmax.f32 %v1917_v2, 0.0 }
 0x24d   : > { %v4632_v32 = vpop.f32.mrf.mxu0 }
 0x24e   : > { %2591 = vmatpush.msra.mxu3 %v2294_v7  ;;  %v2351_v7 = vmax.f32 %v1925_v17, 0.0 }
 0x250   : > { %2592 = vmatpush.msra.mxu3 %v2293_v21  ;;  %3471 = vmatmul.msk.bf16.gmra.mxu0 %vm1168_vm2, %v3604_v34  ;;  %v4656_v34 = vpop.f32.mrf.mxu3  ;;  %v1915_v21 = vadd.f32 %v4121_v8, %v4022_v63 }
 0x252   : > { %2593 = vmatpush.msra.mxu3 %v2292_v27  ;;  %v3605_v27 = vld [vmem:[%s3910_s19 + $0x120] sm:$0xff]  ;;  %v1901_v17 = vpop.f32.mrf.mxu1 }
 0x253   : > { %v1902_v19 = vadd.f32 %v4681_v53, %v1901_v17 }
 0x254   : > { %2594 = vmatpush.msra.mxu3 %v2291_v5  ;;  %v4645_v46 = vpop.f32.mrf.mxu2 }
 0x255   : > { %v4647_v12 = vpop.f32.mrf.mxu0  ;;  %v2342_v8 = vmax.f32 %v1902_v19, 0.0  ;;  %v2040_v16 = vadd.f32 %v4681_v53, %v4645_v46  ;;  %v2032_v46 = vadd.f32 %v4681_v53, %v4596_v52 }
 0x256   : > { %2595 = vmatpush.msra.mxu3 %v2290_v60  ;;  %v2347_v60 = vmax.f32 %v1915_v21, 0.0  ;;  %v2343_v21 = vmax.f32 %v1905_v58, 0.0 }
 0x258   : > { %2596 = vmatpush.msra.mxu3 %v2289_v0  ;;  %v4670_v63 = vpop.f32.mrf.mxu3  ;;  %v3665_v0 = vld [vmem:[%s3910_s19 + $0x300] sm:$0xff] }
 0x259   : > { %2597 = vmatmul.f32.vlgmr.msra.gmra.mxu3 %v2470_v24  ;;  %3532 = vmatmul.msk.bf16.gmra.mxu2 %vm1168_vm2, %v3665_v0  ;;  %v2345_v24 = vmax.f32 %v1910_v4, 0.0  ;;  %v1892_v4 = vadd.f32 %v4681_v53, %v4591_v49  ;;  %v2337_v49 = vmax.f32 %v1890_v61, 0.0  ;;  %v2025_v61 = vadd.f32 %v4681_v53, %v4542_v54 }
 0x25a   : > { %2641 = vmatpush.msrb.mxu3 %v2352_v50  ;;  %v2346_v50 = vmax.f32 %v1912_v9, 0.0 }
 0x25c   : > { %2642 = vmatpush.msrb.mxu3 %v2351_v7  ;;  %v2041_v56 = vpop.f32.mrf.mxu2 }
 0x25d   : > { %v4663_v5 = vpop.f32.mrf.mxu0 }
 0x25e   : > { %2643 = vmatpush.msrb.mxu3 %v2350_v14  ;;  %v1900_v14 = vadd.f32 %v4681_v53, %v1899_v18 }
 0x260   : > { %2644 = vmatpush.msrb.mxu3 %v2349_v45  ;;  %3472 = vmatmul.msk.bf16.gmra.mxu0 %vm1168_vm2, %v3605_v27  ;;  %v4688_v45 = vpop.f32.mrf.mxu3  ;;  %v1895_v27 = vadd.f32 %v4681_v53, %v4611_v20  ;;  %v2341_v9 = vmax.f32 %v1900_v14, 0.0  ;;  %v2338_v20 = vmax.f32 %v1892_v4, 0.0 }
 0x262   : > { %2645 = vmatpush.msrb.mxu3 %v2348_v51  ;;  %v3606_v51 = vld [vmem:[%s3910_s19 + $0x128] sm:$0xff]  ;;  %v2339_v0 = vmax.f32 %v1895_v27, 0.0 }
 0x264   : > { %2646 = vmatpush.msrb.mxu3 %v2347_v60  ;;  %v2044_v7 = vpop.f32.mrf.mxu2  ;;  %v2340_v60 = vmax.f32 %v1897_v43, 0.0 }
 0x265   : > { %v4684_v2 = vpop.f32.mrf.mxu0 }
 0x266   : > { %2647 = vmatpush.msrb.mxu3 %v2346_v50  ;;  %v2045_v50 = vadd.f32 %v4681_v53, %v2044_v7  ;;  %v2037_v7 = vadd.f32 %v4681_v53, %v4628_v37  ;;  %v2030_v37 = vadd.f32 %v4681_v53, %v4576_v57 }
 0x268   : > { %2648 = vmatpush.msrb.mxu3 %v2345_v24  ;;  %v2166_v58 = vpop.f32.mrf.mxu3  ;;  %v2042_v24 = vadd.f32 %v4681_v53, %v2041_v56  ;;  %v2399_v14 = vmax.f32 %v2045_v50, 0.0  ;;  %v2035_v56 = vadd.f32 %v4681_v53, %v4613_v22  ;;  %v2394_v22 = vmax.f32 %v2032_v46, 0.0 }
 0x269   : > { %v2393_v52 = vmax.f32 %v2030_v37, 0.0  ;;  %v2391_v50 = vmax.f32 %v2025_v61, 0.0  ;;  %v2465_v61 = vld [vmem:[%s5188_s3] sm:$0xff] }
 0x26a   : > { %2649 = vmatpush.msrb.mxu3 %v2344_v48  ;;  %v2398_v43 = vmax.f32 %v2042_v24, 0.0  ;;  %v2015_v24 = vadd.f32 %v4681_v53, %v4499_v39  ;;  %v2165_v39 = vadd.f32 %v4681_v53, %v4688_v45  ;;  %v2157_v45 = vadd.f32 %v4681_v53, %v4639_v23  ;;  %2497 = vmatmul.f32.vlgmr.msrb.gmra.mxu1 %v2465_v61 }
 0x26b   : > { %v2152_v23 = vadd.f32 %v4681_v53, %v4607_v29 }
 0x26c   : > { %2650 = vmatpush.msrb.mxu3 %v2343_v21  ;;  %v2046_v17 = vpop.f32.mrf.mxu2  ;;  %v2473_v21 = vld [vmem:[%s5188_s3 + $0x40] sm:$0xff] }
 0x26d   : > { %v4695_v18 = vpop.f32.mrf.mxu0  ;;  %v2047_v41 = vadd.f32 %v4681_v53, %v2046_v17  ;;  %v2027_v17 = vadd.f32 %v4681_v53, %v4561_v6  ;;  %v2020_v6 = vadd.f32 %v4681_v53, %v4515_v47  ;;  %v3608_v47 = vld [vmem:[%s3910_s19 + $0x138] sm:$0xff] }
 0x26e   : > { %2651 = vmatpush.msrb.mxu3 %v2342_v8  ;;  %v2397_v8 = vmax.f32 %v2040_v16, 0.0  ;;  %v2012_v16 = vadd.f32 %v4681_v53, %v4492_v62  ;;  %v2162_v62 = vadd.f32 %v4681_v53, %v4670_v63  ;;  %v1715_v29 = vadd.f32 %v4681_v53, %v4695_v18 }
 0x26f   : > { %v2400_v19 = vmax.f32 %v2047_v41, 0.0  ;;  %v2022_v41 = vadd.f32 %v4681_v53, %v4529_v31  ;;  %v2392_v57 = vmax.f32 %v2027_v17, 0.0  ;;  %v1710_v18 = vadd.f32 %v4681_v53, %v4663_v5 }
 0x270   : > { %2652 = vmatpush.msrb.mxu3 %v2341_v9  ;;  %3473 = vmatmul.msk.bf16.gmra.mxu0 %vm1168_vm2, %v3606_v51  ;;  %v4714_v27 = vpop.f32.mrf.mxu3  ;;  %v2396_v9 = vmax.f32 %v2037_v7, 0.0  ;;  %v3607_v51 = vld [vmem:[%s3910_s19 + $0x130] sm:$0xff]  ;;  %v2446_v17 = vmax.f32 %v2162_v62, 0.0  ;;  %v1702_v62 = vadd.f32 %v4681_v53, %v4617_v1  ;;  %v1697_v1 = vadd.f32 %v4681_v53, %v4580_v3 }
 0x271   : > { %v2390_v54 = vmax.f32 %v2022_v41, 0.0  ;;  %v2265_v5 = vmax.f32 %v1710_v18, 0.0 }
 0x272   : > { %2653 = vmatpush.msrb.mxu3 %v2340_v60  ;;  %v2395_v60 = vmax.f32 %v2035_v56, 0.0  ;;  %v2386_v56 = vmax.f32 %v2012_v16, 0.0  ;;  %v2260_v3 = vmax.f32 %v1697_v1, 0.0 }
 0x274   : > { %2654 = vmatpush.msrb.mxu3 %v2339_v0 }
 0x275   : > { %v4703_v48 = vpop.f32.mrf.mxu0 }
 0x276   : > { %2655 = vmatpush.msrb.mxu3 %v2338_v20 }
 0x278   : > { %2656 = vmatpush.msrb.mxu3 %v2337_v49  ;;  %v4726_v0 = vpop.f32.mrf.mxu3  ;;  %v2017_v49 = vadd.f32 %v4681_v53, %v4508_v55  ;;  %v2387_v55 = vmax.f32 %v2015_v24, 0.0  ;;  %v2147_v24 = vadd.f32 %v4681_v53, %v4553_v42  ;;  %v2142_v42 = vadd.f32 %v4681_v53, %v4521_v28 }
 0x279   : > { %2657 = vmatmul.f32.vlgmr.msrb.gmra.mxu3 %v2473_v21  ;;  %v2010_v21 = vadd.f32 %v4681_v53, %v4485_v40 }
 0x27a   : > { %2701 = vmatpush.msra.mxu3 %v2400_v19  ;;  %v2389_v19 = vmax.f32 %v2020_v6, 0.0  ;;  %v2444_v6 = vmax.f32 %v2157_v45, 0.0  ;;  %v2438_v28 = vmax.f32 %v2142_v42, 0.0  ;;  %v5293_v42 = vld [vmem:[#allocation45_spill] sm:$0xff] }
 0x27c   : > { %2702 = vmatpush.msra.mxu3 %v2399_v14  ;;  %v2388_v14 = vmax.f32 %v2017_v49, 0.0 }
 0x27d   : > { %v1719_v4 = vpop.f32.mrf.mxu0 }
 0x27e   : > { %2703 = vmatpush.msra.mxu3 %v2398_v43  ;;  %v2167_v43 = vadd.f32 %v4681_v53, %v2166_v58  ;;  %v2447_v58 = vmax.f32 %v2165_v39, 0.0  ;;  %v1720_v41 = vadd.f32 %v4681_v53, %v1719_v4  ;;  %v1705_v39 = vadd.f32 %v4681_v53, %v4632_v32 }
 0x27f   : > { %v1700_v32 = vadd.f32 %v4681_v53, %v4600_v15  ;;  %v1695_v15 = vadd.f32 %v4681_v53, %v4563_v36  ;;  %v5288_v36 = vld [vmem:[#allocation60_spill] sm:$0xff] }
 0x280   : > { %2704 = vmatpush.msra.mxu3 %v2397_v8  ;;  %3474 = vmatmul.msk.bf16.gmra.mxu0 %vm1168_vm2, %v3607_v51  ;;  %v4736_v31 = vpop.f32.mrf.mxu3  ;;  %v2385_v8 = vmax.f32 %v2010_v21, 0.0  ;;  %v2448_v46 = vmax.f32 %v2167_v43, 0.0  ;;  %v2440_v21 = vmax.f32 %v2147_v24, 0.0  ;;  %v2468_v24 = vld [vmem:[%s5188_s3 + $0x18] sm:$0xff] }
 0x282   : > { %2705 = vmatpush.msra.mxu3 %v2396_v9  ;;  %v2160_v9 = vadd.f32 %v4681_v53, %v4656_v34  ;;  %v2155_v34 = vadd.f32 %v4681_v53, %v4623_v33 }
 0x284   : > { %2706 = vmatpush.msra.mxu3 %v2395_v60  ;;  %v2443_v33 = vmax.f32 %v2155_v34, 0.0 }
 0x285   : > { %v1721_v20 = vpop.f32.mrf.mxu0 }
 0x286   : > { %2707 = vmatpush.msra.mxu3 %v2394_v22  ;;  %v1722_v63 = vadd.f32 %v4681_v53, %v1721_v20  ;;  %v2150_v20 = vadd.f32 %v4681_v53, %v4587_v10  ;;  %v2442_v10 = vmax.f32 %v2152_v23, 0.0 }
 0x288   : > { %2708 = vmatpush.msra.mxu3 %v2393_v52  ;;  %v4749_v40 = vpop.f32.mrf.mxu3  ;;  %v2445_v52 = vmax.f32 %v2160_v9, 0.0  ;;  %v2270_v49 = vmax.f32 %v1722_v63, 0.0  ;;  %v2441_v16 = vmax.f32 %v2150_v20, 0.0  ;;  %v2261_v63 = vmax.f32 %v1700_v32, 0.0 }
 0x28a   : > { %2709 = vmatpush.msra.mxu3 %v2392_v57 }
 0x28c   : > { %2710 = vmatpush.msra.mxu3 %v2391_v50  ;;  %v1717_v50 = vadd.f32 %v4681_v53, %v4703_v48  ;;  %v2145_v48 = vadd.f32 %v4681_v53, %v4536_v30  ;;  %v1707_v30 = vadd.f32 %v4681_v53, %v4647_v12  ;;  %v2137_v12 = vadd.f32 %v4681_v53, %v4504_v13 }
 0x28d   : > { %v1724_v7 = vpop.f32.mrf.mxu0 }
 0x28e   : > { %2711 = vmatpush.msra.mxu3 %v2390_v54  ;;  %v1725_v37 = vadd.f32 %v4681_v53, %v1724_v7  ;;  %v2267_v7 = vmax.f32 %v1715_v29, 0.0  ;;  %v2436_v13 = vmax.f32 %v2137_v12, 0.0  ;;  %v5291_v29 = vld [vmem:[#allocation51_spill] sm:$0xff] }
 0x290   : > { %2712 = vmatpush.msra.mxu3 %v2389_v19  ;;  %3475 = vmatmul.msk.bf16.gmra.mxu0 %vm1168_vm2, %v3608_v47  ;;  %v2271_v57 = vmax.f32 %v1725_v37, 0.0  ;;  %v4772_v4 = vpop.f32.mrf.mxu3  ;;  %v2269_v19 = vmax.f32 %v1720_v41, 0.0  ;;  %v2268_v47 = vmax.f32 %v1717_v50, 0.0  ;;  %v2262_v37 = vmax.f32 %v1702_v62, 0.0 }
 0x291   : > { %v2259_v41 = vmax.f32 %v1695_v15, 0.0 }
 0x292   : > { %2713 = vmatpush.msra.mxu3 %v2388_v14  ;;  %v1712_v14 = vadd.f32 %v4681_v53, %v4684_v2 }
 0x294   : > { %2714 = vmatpush.msra.mxu3 %v2387_v55  ;;  %v2439_v55 = vmax.f32 %v2145_v48, 0.0  ;;  %v2266_v43 = vmax.f32 %v1712_v14, 0.0  ;;  %v5292_v48 = vld [vmem:[#allocation48_spill] sm:$0xff] }
 0x295   : > { %v1726_v51 = vpop.f32.mrf.mxu0 }
 0x296   : > { %2715 = vmatpush.msra.mxu3 %v2386_v56  ;;  %v1727_v60 = vadd.f32 %v4681_v53, %v1726_v51  ;;  %v2140_v56 = vadd.f32 %v4681_v53, %v4511_v26  ;;  %v2135_v26 = vadd.f32 %v4681_v53, %v4497_v11  ;;  %v2132_v51 = vadd.f32 %v4681_v53, %v4488_v35  ;;  %v5287_v11 = vld [vmem:[#allocation93_spill] sm:$0xff] }
 0x297   : > { %v2130_v45 = vadd.f32 %v4681_v53, %v5287_v11 }
 0x298   : > { %2716 = vmatpush.msra.mxu3 %v2385_v8  ;;  %v2272_v22 = vmax.f32 %v1727_v60, 0.0  ;;  %v4794_v8 = vpop.f32.mrf.mxu3  ;;  %v2437_v9 = vmax.f32 %v2140_v56, 0.0  ;;  %v2434_v35 = vmax.f32 %v2132_v51, 0.0  ;;  %v5295_v56 = vld [vmem:[#allocation39_spill] sm:$0xff]  ;;  %v5298_v51 = vld [vmem:[#allocation30_spill] sm:$0xff] }
 0x299   : > { %v2433_v34 = vmax.f32 %v2130_v45, 0.0 }
 0x29a   : > { %2761 = vmatpush.msrb.mxu3 %v2448_v46  ;;  %2541 = vmatpush.msra.mxu1 %v2272_v22  ;;  %v2264_v46 = vmax.f32 %v1707_v30, 0.0  ;;  %v1692_v22 = vadd.f32 %v4681_v53, %v4544_v38 }
 0x29c   : > { %2762 = vmatpush.msrb.mxu3 %v2447_v58  ;;  %2542 = vmatpush.msra.mxu1 %v2271_v57  ;;  %v2263_v58 = vmax.f32 %v1705_v39, 0.0  ;;  %v1847_v57 = vadd.f32 %v4681_v53, %v5288_v36  ;;  %v2258_v23 = vmax.f32 %v1692_v22, 0.0 }
 0x29d   : > { %v4770_v54 = vpop.f32.mrf.mxu0 }
 0x29e   : > { %2763 = vmatpush.msrb.mxu3 %v2446_v17  ;;  %2543 = vmatpush.msra.mxu1 %v2270_v49  ;;  %v2435_v17 = vmax.f32 %v2135_v26, 0.0  ;;  %v5290_v49 = vld [vmem:[#allocation54_spill] sm:$0xff] }
 0x2a0   : > { %2764 = vmatpush.msrb.mxu3 %v2445_v52  ;;  %2544 = vmatpush.msra.mxu1 %v2269_v19  ;;  %v4816_v61 = vpop.f32.mrf.mxu3  ;;  %v1690_v52 = vadd.f32 %v4681_v53, %v4531_v25  ;;  %v2320_v25 = vmax.f32 %v1847_v57, 0.0  ;;  %v1840_v19 = vadd.f32 %v4681_v53, %v5291_v29 }
 0x2a2   : > { %2765 = vmatpush.msrb.mxu3 %v2444_v6  ;;  %2545 = vmatpush.msra.mxu1 %v2268_v47  ;;  %v5289_v6 = vld [vmem:[#allocation57_spill] sm:$0xff]  ;;  %v2257_v50 = vmax.f32 %v1690_v52, 0.0  ;;  %v2317_v18 = vmax.f32 %v1840_v19, 0.0  ;;  %v5302_v52 = vld [vmem:[#allocation18_spill] sm:$0xff] }
 0x2a3   : > { %v1845_v38 = vadd.f32 %v4681_v53, %v5289_v6 }
 0x2a4   : > { %2766 = vmatpush.msrb.mxu3 %v2443_v33  ;;  %2546 = vmatpush.msra.mxu1 %v2267_v7  ;;  %v1842_v33 = vadd.f32 %v4681_v53, %v5290_v49 }
 0x2a5   : > { %v4788_v2 = vpop.f32.mrf.mxu0 }
 0x2a6   : > { %2767 = vmatpush.msrb.mxu3 %v2442_v10  ;;  %2547 = vmatpush.msra.mxu1 %v2266_v43  ;;  %v2319_v10 = vmax.f32 %v1845_v38, 0.0  ;;  %v2318_v14 = vmax.f32 %v1842_v33, 0.0 }
 0x2a8   : > { %2768 = vmatpush.msrb.mxu3 %v2441_v16  ;;  %2548 = vmatpush.msra.mxu1 %v2265_v5  ;;  %v1837_v16 = vadd.f32 %v4681_v53, %v5292_v48  ;;  %v4835_v47 = vpop.f32.mrf.mxu3  ;;  %v5296_v5 = vld [vmem:[#allocation36_spill] sm:$0xff] }
 0x2a9   : > { %v1827_v12 = vadd.f32 %v4681_v53, %v5296_v5 }
 0x2aa   : > { %2769 = vmatpush.msrb.mxu3 %v2440_v21  ;;  %2549 = vmatpush.msra.mxu1 %v2264_v46  ;;  %v1835_v21 = vadd.f32 %v4681_v53, %v5293_v42  ;;  %v2316_v43 = vmax.f32 %v1837_v16, 0.0  ;;  %v5297_v46 = vld [vmem:[#allocation33_spill] sm:$0xff]  ;;  %v5307_v42 = vld [vmem:[#allocation35_spill] sm:$0xff] }
 0x2ab   : > { %v1825_v26 = vadd.f32 %v4681_v53, %v5297_v46  ;;  %v2312_v1 = vmax.f32 %v1827_v12, 0.0 }
 0x2ac   : > { %2770 = vmatpush.msrb.mxu3 %v2439_v55  ;;  %2550 = vmatpush.msra.mxu1 %v2263_v58  ;;  %v5294_v55 = vld [vmem:[#allocation42_spill] sm:$0xff]  ;;  %v2315_v39 = vmax.f32 %v1835_v21, 0.0  ;;  %v1960_v21 = vadd.f32 %v4681_v53, %v5307_v42 }
 0x2ad   : > { %v4808_v60 = vpop.f32.mrf.mxu0  ;;  %v1832_v30 = vadd.f32 %v4681_v53, %v5294_v55  ;;  %v2311_v45 = vmax.f32 %v1825_v26, 0.0 }
 0x2ae   : > { %2771 = vmatpush.msrb.mxu3 %v2438_v28  ;;  %2551 = vmatpush.msra.mxu1 %v2262_v37  ;;  %v1830_v28 = vadd.f32 %v4681_v53, %v5295_v56  ;;  %v5299_v37 = vld [vmem:[#allocation27_spill] sm:$0xff]  ;;  %v2365_v5 = vmax.f32 %v1960_v21, 0.0 }
 0x2af   : > { %v2314_v62 = vmax.f32 %v1832_v30, 0.0  ;;  %v1820_v11 = vadd.f32 %v4681_v53, %v5299_v37  ;;  %v5308_v30 = vld [vmem:[#allocation32_spill] sm:$0xff] }
 0x2b0   : > { %2772 = vmatpush.msrb.mxu3 %v2437_v9  ;;  %2552 = vmatpush.msra.mxu1 %v2261_v63  ;;  %v2313_v9 = vmax.f32 %v1830_v28, 0.0  ;;  %v4851_v58 = vpop.f32.mrf.mxu3  ;;  %v5309_v28 = vld [vmem:[#allocation29_spill] sm:$0xff] }
 0x2b2   : > { %2773 = vmatpush.msrb.mxu3 %v2436_v13  ;;  %2553 = vmatpush.msra.mxu1 %v2260_v3  ;;  %v1822_v13 = vadd.f32 %v4681_v53, %v5298_v51  ;;  %v2309_v3 = vmax.f32 %v1820_v11, 0.0 }
 0x2b4   : > { %2774 = vmatpush.msrb.mxu3 %v2435_v17  ;;  %2554 = vmatpush.msra.mxu1 %v2259_v41  ;;  %v5300_v17 = vld [vmem:[#allocation24_spill] sm:$0xff]  ;;  %v2310_v63 = vmax.f32 %v1822_v13, 0.0  ;;  %v1812_v41 = vadd.f32 %v4681_v53, %v5302_v52 }
 0x2b5   : > { %v4824_v20 = vpop.f32.mrf.mxu0  ;;  %v1817_v15 = vadd.f32 %v4681_v53, %v5300_v17  ;;  %v5313_v17 = vld [vmem:[#allocation17_spill] sm:$0xff] }
 0x2b6   : > { %2775 = vmatpush.msrb.mxu3 %v2434_v35  ;;  %2555 = vmatpush.msra.mxu1 %v2258_v23  ;;  %v5301_v35 = vld [vmem:[#allocation21_spill] sm:$0xff]  ;;  %v5303_v23 = vld [vmem:[#allocation15_spill] sm:$0xff]  ;;  %v2306_v33 = vmax.f32 %v1812_v41, 0.0  ;;  %v5315_v41 = vld [vmem:[#allocation12_spill] sm:$0xff] }
 0x2b7   : > { %v1815_v22 = vadd.f32 %v4681_v53, %v5301_v35  ;;  %v2308_v36 = vmax.f32 %v1817_v15, 0.0  ;;  %v1810_v6 = vadd.f32 %v4681_v53, %v5303_v23  ;;  %v1945_v15 = vadd.f32 %v4681_v53, %v5313_v17 }
 0x2b8   : > { %2776 = vmatpush.msrb.mxu3 %v2433_v34  ;;  %2556 = vmatpush.msra.mxu1 %v2257_v50  ;;  %v4865_v57 = vpop.f32.mrf.mxu3  ;;  %v5304_v50 = vld [vmem:[#allocation44_spill] sm:$0xff] }
 0x2b9   : > { %2557 = vmatmul.f32.vlgmr.msra.gmra.mxu1 %v2468_v24  ;;  %v2307_v38 = vmax.f32 %v1815_v22, 0.0  ;;  %v1967_v49 = vadd.f32 %v4681_v53, %v5304_v50  ;;  %v2305_v29 = vmax.f32 %v1810_v6, 0.0  ;;  %v5314_v22 = vld [vmem:[#allocation14_spill] sm:$0xff]  ;;  %v2359_v23 = vmax.f32 %v1945_v15, 0.0 }
 0x2ba   : > { %2601 = vmatpush.msrb.mxu1 %v2320_v25  ;;  %v5305_v25 = vld [vmem:[#allocation41_spill] sm:$0xff]  ;;  %v5316_v6 = vld [vmem:[#allocation10_spill] sm:$0xff] }
 0x2bb   : > { %v1965_v24 = vadd.f32 %v4681_v53, %v5305_v25  ;;  %v2368_v16 = vmax.f32 %v1967_v49, 0.0  ;;  %v5317_v49 = vld [vmem:[#allocation8_spill] sm:$0xff] }
 0x2bc   : > { %2602 = vmatpush.msrb.mxu1 %v2319_v10  ;;  %v5306_v10 = vld [vmem:[#allocation38_spill] sm:$0xff] }
 0x2bd   : > { %v4839_v7 = vpop.f32.mrf.mxu0  ;;  %v1962_v48 = vadd.f32 %v4681_v53, %v5306_v10  ;;  %v5318_v10 = vld [vmem:[#allocation6_spill] sm:$0xff] }
 0x2be   : > { %2603 = vmatpush.msrb.mxu1 %v2318_v14  ;;  %v2471_v14 = vld [vmem:[%s5188_s3 + $0x30] sm:$0xff] }
 0x2bf   : > { %v2366_v56 = vmax.f32 %v1962_v48, 0.0  ;;  %v1932_v48 = vadd.f32 %v4681_v53, %v5318_v10 }
 0x2c0   : > { %2604 = vmatpush.msrb.mxu1 %v2317_v18  ;;  %v2367_v18 = vmax.f32 %v1965_v24, 0.0  ;;  %v4882_v55 = vpop.f32.mrf.mxu3 }
 0x2c2   : > { %2605 = vmatpush.msrb.mxu1 %v2316_v43  ;;  %v1957_v43 = vadd.f32 %v4681_v53, %v5308_v30 }
 0x2c4   : > { %2606 = vmatpush.msrb.mxu1 %v2315_v39  ;;  %v1955_v39 = vadd.f32 %v4681_v53, %v5309_v28  ;;  %v2364_v26 = vmax.f32 %v1957_v43, 0.0  ;;  %v2354_v43 = vmax.f32 %v1932_v48, 0.0 }
 0x2c5   : > { %v4849_v32 = vpop.f32.mrf.mxu0 }
 0x2c6   : > { %2607 = vmatpush.msrb.mxu1 %v2314_v62  ;;  %v5310_v62 = vld [vmem:[#allocation26_spill] sm:$0xff]  ;;  %v2363_v13 = vmax.f32 %v1955_v39, 0.0 }
 0x2c7   : > { %v1952_v46 = vadd.f32 %v4681_v53, %v5310_v62 }
 0x2c8   : > { %2608 = vmatpush.msrb.mxu1 %v2313_v9  ;;  %v5311_v9 = vld [vmem:[#allocation23_spill] sm:$0xff] }
 0x2c9   : > { %v1950_v51 = vadd.f32 %v4681_v53, %v5311_v9  ;;  %v2362_v11 = vmax.f32 %v1952_v46, 0.0  ;;  %v2474_v9 = vld [vmem:[%s5188_s3 + $0x48] sm:$0xff] }
 0x2ca   : > { %2609 = vmatpush.msrb.mxu1 %v2312_v1  ;;  %v5312_v1 = vld [vmem:[#allocation20_spill] sm:$0xff] }
 0x2cb   : > { %v1947_v37 = vadd.f32 %v4681_v53, %v5312_v1 }
 0x2cc   : > { %2610 = vmatpush.msrb.mxu1 %v2311_v45  ;;  %v4896_v45 = vpop.f32.mrf.mxu3 }
 0x2cd   : > { %v4861_v34 = vpop.f32.mrf.mxu0  ;;  %v2360_v52 = vmax.f32 %v1947_v37, 0.0 }
 0x2ce   : > { %2611 = vmatpush.msrb.mxu1 %v2310_v63  ;;  %v2361_v63 = vmax.f32 %v1950_v51, 0.0  ;;  %v5323_v51 = vld [vmem:[#allocation34_spill] sm:$0xff] }
 0x2d0   : > { %2612 = vmatpush.msrb.mxu1 %v2309_v3  ;;  %v1942_v3 = vadd.f32 %v4681_v53, %v5314_v22 }
 0x2d2   : > { %2613 = vmatpush.msrb.mxu1 %v2308_v36  ;;  %v1940_v36 = vadd.f32 %v4681_v53, %v5315_v41  ;;  %v2358_v50 = vmax.f32 %v1942_v3, 0.0 }
 0x2d4   : > { %2614 = vmatpush.msrb.mxu1 %v2307_v38  ;;  %v1937_v38 = vadd.f32 %v4681_v53, %v5316_v6  ;;  %v2357_v25 = vmax.f32 %v1940_v36, 0.0  ;;  %v2466_v6 = vld [vmem:[%s5188_s3 + $0x8] sm:$0xff] }
 0x2d5   : > { %v4873_v19 = vpop.f32.mrf.mxu0  ;;  %2517 = vmatmul.f32.vlgmr.msrb.gmra.mxu2 %v2466_v6 }
 0x2d6   : > { %2615 = vmatpush.msrb.mxu1 %v2306_v33  ;;  %v1935_v33 = vadd.f32 %v4681_v53, %v5317_v49 }
 0x2d8   : > { %2616 = vmatpush.msrb.mxu1 %v2305_v29  ;;  %v4912_v29 = vpop.f32.mrf.mxu3  ;;  %v2355_v21 = vmax.f32 %v1935_v33, 0.0 }
 0x2d9   : > { %2617 = vmatmul.f32.vlgmr.msrb.gmra.mxu1 %v2471_v14  ;;  %v5319_v14 = vld [vmem:[#allocation5_spill] sm:$0xff] }
 0x2da   : > { %2661 = vmatpush.msra.mxu1 %v2368_v16  ;;  %v2356_v16 = vmax.f32 %v1937_v38, 0.0  ;;  %v1930_v42 = vadd.f32 %v4681_v53, %v5319_v14  ;;  %v5329_v14 = vld [vmem:[#allocation16_spill] sm:$0xff] }
 0x2dc   : > { %2662 = vmatpush.msra.mxu1 %v2367_v18  ;;  %v5320_v18 = vld [vmem:[#allocation43_spill] sm:$0xff]  ;;  %v2353_v39 = vmax.f32 %v1930_v42, 0.0  ;;  %v2049_v38 = vpop.f32.mrf.mxu2  ;;  %v2065_v42 = vadd.f32 %v4681_v53, %v5329_v14 }
 0x2dd   : > { %v4888_v12 = vpop.f32.mrf.mxu0  ;;  %v2087_v30 = vadd.f32 %v4681_v53, %v5320_v18  ;;  %v5330_v18 = vld [vmem:[#allocation13_spill] sm:$0xff] }
 0x2de   : > { %2663 = vmatpush.msra.mxu1 %v2366_v56  ;;  %v5321_v56 = vld [vmem:[#allocation40_spill] sm:$0xff] }
 0x2df   : > { %v2085_v28 = vadd.f32 %v4681_v53, %v5321_v56  ;;  %v2416_v46 = vmax.f32 %v2087_v30, 0.0  ;;  %v2062_v30 = vadd.f32 %v4681_v53, %v5330_v18  ;;  %v2195_v18 = vadd.f32 %v4681_v53, %v4882_v55 }
 0x2e0   : > { %2664 = vmatpush.msra.mxu1 %v2365_v5  ;;  %v5322_v5 = vld [vmem:[#allocation37_spill] sm:$0xff]  ;;  %v2201_v37 = vpop.f32.mrf.mxu3 }
 0x2e1   : > { %v2082_v62 = vadd.f32 %v4681_v53, %v5322_v5  ;;  %v2415_v1 = vmax.f32 %v2085_v28, 0.0  ;;  %v5331_v28 = vld [vmem:[#allocation11_spill] sm:$0xff]  ;;  %v2407_v5 = vmax.f32 %v2065_v42, 0.0  ;;  %v2197_v42 = vadd.f32 %v4681_v53, %v4896_v45 }
 0x2e2   : > { %2665 = vmatpush.msra.mxu1 %v2364_v26  ;;  %v2459_v55 = vmax.f32 %v2195_v18, 0.0 }
 0x2e3   : > { %v2414_v15 = vmax.f32 %v2082_v62, 0.0 }
 0x2e4   : > { %2666 = vmatpush.msra.mxu1 %v2363_v13  ;;  %v2080_v13 = vadd.f32 %v4681_v53, %v5323_v51  ;;  %v2051_v62 = vpop.f32.mrf.mxu2  ;;  %v2406_v51 = vmax.f32 %v2062_v30, 0.0 }
 0x2e5   : > { %v4900_v35 = vpop.f32.mrf.mxu0 }
 0x2e6   : > { %2667 = vmatpush.msra.mxu1 %v2362_v11  ;;  %v5324_v11 = vld [vmem:[#allocation31_spill] sm:$0xff]  ;;  %v2413_v3 = vmax.f32 %v2080_v13, 0.0 }
 0x2e7   : > { %v2077_v17 = vadd.f32 %v4681_v53, %v5324_v11  ;;  %v5333_v13 = vld [vmem:[#allocation7_spill] sm:$0xff] }
 0x2e8   : > { %2668 = vmatpush.msra.mxu1 %v2361_v63  ;;  %v5325_v63 = vld [vmem:[#allocation28_spill] sm:$0xff] }
 0x2e9   : > { %v2075_v22 = vadd.f32 %v4681_v53, %v5325_v63  ;;  %v2412_v36 = vmax.f32 %v2077_v17, 0.0  ;;  %v2052_v17 = vadd.f32 %v4681_v53, %v2051_v62 }
 0x2ea   : > { %2669 = vmatpush.msra.mxu1 %v2360_v52  ;;  %v5326_v52 = vld [vmem:[#allocation25_spill] sm:$0xff] }
 0x2eb   : > { %v2072_v41 = vadd.f32 %v4681_v53, %v5326_v52  ;;  %v2411_v33 = vmax.f32 %v2075_v22, 0.0 }
 0x2ec   : > { %2670 = vmatpush.msra.mxu1 %v2359_v23 }
 0x2ed   : > { %v4910_v24 = vpop.f32.mrf.mxu0  ;;  %v2410_v48 = vmax.f32 %v2072_v41, 0.0 }
 0x2ee   : > { %2671 = vmatpush.msra.mxu1 %v2358_v50  ;;  %v5327_v50 = vld [vmem:[#allocation22_spill] sm:$0xff] }
 0x2ef   : > { %v2070_v49 = vadd.f32 %v4681_v53, %v5327_v50 }
 0x2f0   : > { %2672 = vmatpush.msra.mxu1 %v2357_v25  ;;  %v5328_v25 = vld [vmem:[#allocation19_spill] sm:$0xff] }
 0x2f1   : > { %v2067_v10 = vadd.f32 %v4681_v53, %v5328_v25  ;;  %v2200_v25 = vadd.f32 %v4681_v53, %v4912_v29 }
 0x2f2   : > { %2673 = vmatpush.msra.mxu1 %v2356_v16  ;;  %v2204_v16 = vpop.f32.mrf.mxu3 }
 0x2f3   : > { %v2205_v6 = vadd.f32 %v4681_v53, %v2204_v16  ;;  %v2461_v30 = vmax.f32 %v2200_v25, 0.0 }
 0x2f4   : > { %2674 = vmatpush.msra.mxu1 %v2355_v21  ;;  %v2409_v21 = vmax.f32 %v2070_v49, 0.0  ;;  %v2202_v49 = vadd.f32 %v4681_v53, %v2201_v37 }
 0x2f5   : > { %v4924_v26 = vpop.f32.mrf.mxu0 }
 0x2f6   : > { %2675 = vmatpush.msra.mxu1 %v2354_v43  ;;  %v2408_v43 = vmax.f32 %v2067_v10, 0.0  ;;  %v2463_v10 = vmax.f32 %v2205_v6, 0.0  ;;  %v2462_v16 = vmax.f32 %v2202_v49, 0.0  ;;  %v1757_v45 = vadd.f32 %v4681_v53, %v4924_v26 }
 0x2f7   : > { %v1752_v26 = vadd.f32 %v4681_v53, %v4900_v35  ;;  %v1747_v35 = vadd.f32 %v4681_v53, %v4873_v19  ;;  %v2177_v19 = vadd.f32 %v4681_v53, %v4749_v40 }
 0x2f8   : > { %2676 = vmatpush.msra.mxu1 %v2353_v39  ;;  %v2060_v39 = vadd.f32 %v4681_v53, %v5331_v28  ;;  %v2192_v28 = vadd.f32 %v4681_v53, %v4865_v57  ;;  %v2187_v57 = vadd.f32 %v4681_v53, %v4835_v47  ;;  %v2182_v47 = vadd.f32 %v4681_v53, %v4794_v8 }
 0x2f9   : > { %2677 = vmatmul.f32.vlgmr.msra.gmra.mxu1 %v2474_v9  ;;  %v1742_v8 = vadd.f32 %v4681_v53, %v4849_v32  ;;  %v2452_v40 = vmax.f32 %v2177_v19, 0.0  ;;  %v5049_v19 = vld [vmem:[%s5187_s2] ss:$0 sm:$0xff] }
 0x2fa   : > { %2721 = vmatpush.msrb.mxu1 %v2416_v46  ;;  %v5332_v46 = vld [vmem:[#allocation9_spill] sm:$0xff]  ;;  %v2405_v11 = vmax.f32 %v2060_v39, 0.0  ;;  %v2460_v39 = vmax.f32 %v2197_v42, 0.0 }
 0x2fb   : > { %v2057_v9 = vadd.f32 %v4681_v53, %v5332_v46  ;;  %v2458_v46 = vmax.f32 %v2192_v28, 0.0  ;;  %v2278_v32 = vmax.f32 %v1742_v8, 0.0  ;;  %v5338_v28 = vld [vmem:[#allocation91_spill] sm:$0xff] }
 0x2fc   : > { %2722 = vmatpush.msrb.mxu1 %v2415_v1  ;;  %v2055_v1 = vadd.f32 %v4681_v53, %v5333_v13 }
 0x2fd   : > { %v1759_v23 = vpop.f32.mrf.mxu0  ;;  %v2404_v63 = vmax.f32 %v2057_v9, 0.0  ;;  %v2284_v9 = vmax.f32 %v1757_v45, 0.0 }
 0x2fe   : > { %2723 = vmatpush.msrb.mxu1 %v2414_v15  ;;  %v2206_v15 = vpop.f32.mrf.mxu3  ;;  %v2403_v41 = vmax.f32 %v2055_v1, 0.0  ;;  %v1760_v29 = vadd.f32 %v4681_v53, %v1759_v23  ;;  %v1755_v23 = vadd.f32 %v4681_v53, %v4910_v24  ;;  %v1750_v24 = vadd.f32 %v4681_v53, %v4888_v12 }
 0x2ff   : > { %v2207_v52 = vadd.f32 %v4681_v53, %v2206_v15  ;;  %v2456_v1 = vmax.f32 %v2187_v57, 0.0  ;;  %v2180_v12 = vadd.f32 %v4681_v53, %v4772_v4 }
 0x300   : > { %2724 = vmatpush.msrb.mxu1 %v2413_v3  ;;  %v2050_v3 = vadd.f32 %v4681_v53, %v2049_v38  ;;  %v2285_v62 = vmax.f32 %v1760_v29, 0.0  ;;  %v2283_v13 = vmax.f32 %v1755_v23, 0.0  ;;  %v2281_v15 = vmax.f32 %v1750_v24, 0.0  ;;  %v5340_v23 = vld [vmem:[#allocation85_spill] sm:$0xff] }
 0x301   : > { %v2453_v4 = vmax.f32 %v2180_v12, 0.0 }
 0x302   : > { %2725 = vmatpush.msrb.mxu1 %v2412_v36  ;;  %v2402_v36 = vmax.f32 %v2052_v17, 0.0  ;;  %v2401_v50 = vmax.f32 %v2050_v3, 0.0  ;;  %v1740_v3 = vadd.f32 %v4681_v53, %v4839_v7  ;;  %v1735_v7 = vadd.f32 %v4681_v53, %v4808_v60 }
 0x304   : > { %2726 = vmatpush.msrb.mxu1 %v2411_v33  ;;  %v2464_v33 = vmax.f32 %v2207_v52, 0.0  ;;  %v2175_v52 = vadd.f32 %v4681_v53, %v4736_v31  ;;  %v2277_v6 = vmax.f32 %v1740_v3, 0.0  ;;  %v2275_v25 = vmax.f32 %v1735_v7, 0.0  ;;  %v5347_v3 = vld [vmem:[#allocation64_spill] sm:$0xff]  ;;  %v5350_v7 = vld [vmem:[#allocation86_spill] sm:$0xff] }
 0x305   : > { %v1761_v56 = vpop.f32.mrf.mxu0 }
 0x306   : > { %2727 = vmatpush.msrb.mxu1 %v2410_v48  ;;  %v2451_v31 = vmax.f32 %v2175_v52, 0.0 }
 0x308   : > { %2728 = vmatpush.msrb.mxu1 %v2409_v21  ;;  %v1762_v21 = vadd.f32 %v4681_v53, %v1761_v56  ;;  %v2190_v56 = vadd.f32 %v4681_v53, %v4851_v58  ;;  %v2185_v58 = vadd.f32 %v4681_v53, %v4816_v61  ;;  %v1745_v61 = vadd.f32 %v4681_v53, %v4861_v34 }
 0x30a   : > { %2729 = vmatpush.msrb.mxu1 %v2408_v43  ;;  %v2455_v17 = vmax.f32 %v2185_v58, 0.0  ;;  %v2279_v34 = vmax.f32 %v1745_v61, 0.0  ;;  %v5342_v58 = vld [vmem:[#allocation79_spill] sm:$0xff]  ;;  %v5345_v61 = vld [vmem:[#allocation70_spill] sm:$0xff] }
 0x30c   : > { %2730 = vmatpush.msrb.mxu1 %v2407_v5  ;;  %v2286_v5 = vmax.f32 %v1762_v21, 0.0 }
 0x30d   : > { %v1764_v22 = vpop.f32.mrf.mxu0 }
 0x30e   : > { %2731 = vmatpush.msrb.mxu1 %v2406_v51  ;;  %v1765_v38 = vadd.f32 %v4681_v53, %v1764_v22  ;;  %v2457_v51 = vmax.f32 %v2190_v56, 0.0  ;;  %v2280_v22 = vmax.f32 %v1747_v35, 0.0  ;;  %v5344_v35 = vld [vmem:[#allocation73_spill] sm:$0xff] }
 0x310   : > { %2732 = vmatpush.msrb.mxu1 %v2405_v11  ;;  %v2287_v43 = vmax.f32 %v1765_v38, 0.0  ;;  %v2282_v11 = vmax.f32 %v1752_v26, 0.0  ;;  %v5334_v38 = vld [vmem:[#allocation97_spill] sm:$0xff] }
 0x312   : > { %2733 = vmatpush.msrb.mxu1 %v2404_v63  ;;  %v2454_v63 = vmax.f32 %v2182_v47, 0.0 }
 0x314   : > { %2734 = vmatpush.msrb.mxu1 %v2403_v41  ;;  %v1737_v41 = vadd.f32 %v4681_v53, %v4824_v20  ;;  %v1732_v20 = vadd.f32 %v4681_v53, %v4788_v2  ;;  %v1885_v2 = vadd.f32 %v4681_v53, %v4525_v44 }
 0x315   : > { %v1766_v48 = vpop.f32.mrf.mxu0 }
 0x316   : > { %2735 = vmatpush.msrb.mxu1 %v2402_v36  ;;  %v1767_v14 = vadd.f32 %v4681_v53, %v1766_v48  ;;  %v2172_v36 = vadd.f32 %v4681_v53, %v4726_v0  ;;  %v2276_v49 = vmax.f32 %v1737_v41, 0.0  ;;  %v1730_v0 = vadd.f32 %v4681_v53, %v4770_v54  ;;  %v2469_v54 = vld [vmem:[%s5188_s3 + $0x20] sm:$0xff] }
 0x317   : > { %v2274_v60 = vmax.f32 %v1732_v20, 0.0  ;;  %v2335_v21 = vmax.f32 %v1885_v2, 0.0  ;;  %v5351_v20 = vld [vmem:[#allocation83_spill] sm:$0xff] }
 0x318   : > { %2736 = vmatpush.msrb.mxu1 %v2401_v50  ;;  %v2288_v37 = vmax.f32 %v1767_v14, 0.0  ;;  %v2170_v50 = vadd.f32 %v4681_v53, %v4714_v27  ;;  %v1887_v27 = vadd.f32 %v4681_v53, %v4546_v59  ;;  %v2273_v48 = vmax.f32 %v1730_v0, 0.0  ;;  %v2476_v0 = vld [vmem:[%s5188_s3 + $0x58] sm:$0xff] }
 0x319   : > { %v1882_v14 = vadd.f32 %v4681_v53, %v5334_v38  ;;  %2717 = vmatmul.f32.vlgmr.msra.gmra.mxu3 %v2476_v0  ;;  %v5354_v38 = vld [vmem:[#allocation74_spill] sm:$0xff] }
 0x31a   : > { %2781 = vmatpush.msra.mxu1 %v2464_v33  ;;  %2561 = vmatpush.msra.mxu2 %v2288_v37  ;;  %v2450_v33 = vmax.f32 %v2172_v36, 0.0  ;;  %v2336_v42 = vmax.f32 %v1887_v27, 0.0  ;;  %v5336_v37 = vld [vmem:[#allocation95_spill] sm:$0xff]  ;;  %v5349_v36 = vld [vmem:[#allocation89_spill] sm:$0xff] }
 0x31b   : > { %v1877_v44 = vadd.f32 %v4681_v53, %v5336_v37  ;;  %v2334_v18 = vmax.f32 %v1882_v14, 0.0  ;;  %v1992_v14 = vadd.f32 %v5049_v19, %v5354_v38  ;;  %v5356_v37 = vld [vmem:[#allocation68_spill] sm:$0xff] }
 0x31c   : > { %2782 = vmatpush.msra.mxu1 %v2463_v10  ;;  %2562 = vmatpush.msra.mxu2 %v2287_v43  ;;  %v2449_v10 = vmax.f32 %v2170_v50, 0.0 }
 0x31d   : > { %v2332_v45 = vmax.f32 %v1877_v44, 0.0  ;;  %v1987_v44 = vadd.f32 %v5049_v19, %v5356_v37  ;;  %v5376_v37 = vld [vmem:[#allocation55_spill] sm:$0xff] }
 0x31e   : > { %2783 = vmatpush.msra.mxu1 %v2462_v16  ;;  %2563 = vmatpush.msra.mxu2 %v2286_v5  ;;  %v5335_v16 = vld [vmem:[#allocation96_spill] sm:$0xff] }
 0x31f   : > { %v1880_v59 = vadd.f32 %v4681_v53, %v5335_v16  ;;  %v5339_v5 = vld [vmem:[#allocation88_spill] sm:$0xff] }
 0x320   : > { %2784 = vmatpush.msra.mxu1 %v2461_v30  ;;  %2564 = vmatpush.msra.mxu2 %v2285_v62  ;;  %v5337_v30 = vld [vmem:[#allocation94_spill] sm:$0xff]  ;;  %v1870_v56 = vadd.f32 %v4681_v53, %v5339_v5  ;;  %v1867_v62 = vadd.f32 %v4681_v53, %v5340_v23  ;;  %v5359_v5 = vld [vmem:[#allocation59_spill] sm:$0xff]  ;;  %v5360_v23 = vld [vmem:[#allocation56_spill] sm:$0xff] }
 0x321   : > { %v1875_v29 = vadd.f32 %v4681_v53, %v5337_v30  ;;  %v2333_v43 = vmax.f32 %v1880_v59, 0.0  ;;  %v5357_v30 = vld [vmem:[#allocation65_spill] sm:$0xff] }
 0x322   : > { %2785 = vmatpush.msra.mxu1 %v2460_v39  ;;  %2565 = vmatpush.msra.mxu2 %v2284_v9  ;;  %v1872_v39 = vadd.f32 %v4681_v53, %v5338_v28  ;;  %v2329_v9 = vmax.f32 %v1870_v56, 0.0  ;;  %v2328_v24 = vmax.f32 %v1867_v62, 0.0  ;;  %v5358_v28 = vld [vmem:[#allocation62_spill] sm:$0xff]  ;;  %v1980_v56 = vadd.f32 %v5049_v19, %v5359_v5 }
 0x323   : > { %v1977_v62 = vadd.f32 %v5049_v19, %v5360_v23  ;;  %v5379_v5 = vld [vmem:[#allocation46_spill] sm:$0xff] }
 0x324   : > { %2786 = vmatpush.msra.mxu1 %v2459_v55  ;;  %2566 = vmatpush.msra.mxu2 %v2283_v13  ;;  %v2331_v55 = vmax.f32 %v1875_v29, 0.0  ;;  %v2330_v57 = vmax.f32 %v1872_v39, 0.0  ;;  %v5343_v13 = vld [vmem:[#allocation76_spill] sm:$0xff]  ;;  %v1985_v29 = vadd.f32 %v5049_v19, %v5357_v30  ;;  %v1982_v39 = vadd.f32 %v5049_v19, %v5358_v28  ;;  %v5378_v28 = vld [vmem:[#allocation49_spill] sm:$0xff] }
 0x325   : > { %v1860_v47 = vadd.f32 %v4681_v53, %v5343_v13  ;;  %v5363_v13 = vld [vmem:[#allocation47_spill] sm:$0xff]  ;;  %v5377_v30 = vld [vmem:[#allocation52_spill] sm:$0xff] }
 0x326   : > { %2787 = vmatpush.msra.mxu1 %v2458_v46  ;;  %2567 = vmatpush.msra.mxu2 %v2282_v11  ;;  %v5341_v46 = vld [vmem:[#allocation82_spill] sm:$0xff]  ;;  %v1857_v11 = vadd.f32 %v4681_v53, %v5344_v35 }
 0x327   : > { %v1865_v26 = vadd.f32 %v4681_v53, %v5341_v46  ;;  %v2325_v12 = vmax.f32 %v1860_v47, 0.0  ;;  %v5361_v46 = vld [vmem:[#allocation53_spill] sm:$0xff]  ;;  %v1970_v47 = vadd.f32 %v5049_v19, %v5363_v13  ;;  %v5364_v35 = vld [vmem:[#allocation90_spill] sm:$0xff] }
 0x328   : > { %2788 = vmatpush.msra.mxu1 %v2457_v51  ;;  %2568 = vmatpush.msra.mxu2 %v2281_v15  ;;  %v1862_v51 = vadd.f32 %v4681_v53, %v5342_v58  ;;  %v1855_v15 = vadd.f32 %v4681_v53, %v5345_v61  ;;  %v5362_v58 = vld [vmem:[#allocation50_spill] sm:$0xff]  ;;  %v5365_v61 = vld [vmem:[#allocation87_spill] sm:$0xff] }
 0x32a   : > { %2789 = vmatpush.msra.mxu1 %v2456_v1  ;;  %2569 = vmatpush.msra.mxu2 %v2280_v22  ;;  %v2327_v1 = vmax.f32 %v1865_v26, 0.0  ;;  %v2324_v22 = vmax.f32 %v1857_v11, 0.0  ;;  %v2323_v52 = vmax.f32 %v1855_v15, 0.0  ;;  %v1975_v26 = vadd.f32 %v5049_v19, %v5361_v46  ;;  %v2498_v46 = vpop.f32.mrf.mxu1 }
 0x32b   : > { %v2127_v11 = vadd.f32 %v5049_v19, %v5364_v35  ;;  %v2125_v15 = vadd.f32 %v5049_v19, %v5365_v61  ;;  %v2801_v61 = vld [vmem:[%s5189_s4] sm:$0xff] }
 0x32c   : > { %2790 = vmatpush.msra.mxu1 %v2455_v17  ;;  %2570 = vmatpush.msra.mxu2 %v2279_v34  ;;  %v2326_v17 = vmax.f32 %v1862_v51, 0.0  ;;  %v1850_v34 = vadd.f32 %v5049_v19, %v5347_v3  ;;  %v1972_v51 = vadd.f32 %v5049_v19, %v5362_v58  ;;  %v2475_v3 = vld [vmem:[%s5188_s3 + $0x50] sm:$0xff]  ;;  %v2538_v58 = vpop.f32.mrf.mxu3 }
 0x32e   : > { %2791 = vmatpush.msra.mxu1 %v2454_v63  ;;  %2571 = vmatpush.msra.mxu2 %v2278_v32  ;;  %v5346_v63 = vld [vmem:[#allocation67_spill] sm:$0xff] }
 0x32f   : > { %v1852_v8 = vadd.f32 %v4681_v53, %v5346_v63  ;;  %v2005_v53 = vadd.f32 %v5049_v19, %v5349_v36  ;;  %v5366_v63 = vld [vmem:[#allocation84_spill] sm:$0xff]  ;;  %v5368_v36 = vld [vmem:[#allocation78_spill] sm:$0xff] }
 0x330   : > { %2792 = vmatpush.msra.mxu1 %v2453_v4  ;;  %2572 = vmatpush.msra.mxu2 %v2277_v6  ;;  %v5348_v4 = vld [vmem:[#allocation92_spill] sm:$0xff]  ;;  %v2002_v6 = vadd.f32 %v5049_v19, %v5350_v7  ;;  %v5369_v7 = vld [vmem:[#allocation75_spill] sm:$0xff] }
 0x331   : > { %v2007_v41 = vadd.f32 %v5049_v19, %v5348_v4  ;;  %v2322_v32 = vmax.f32 %v1852_v8, 0.0  ;;  %v2122_v8 = vadd.f32 %v5049_v19, %v5366_v63  ;;  %v5367_v4 = vld [vmem:[#allocation81_spill] sm:$0xff] }
 0x332   : > { %2793 = vmatpush.msra.mxu1 %v2452_v40  ;;  %2573 = vmatpush.msra.mxu2 %v2276_v49  ;;  %v2321_v40 = vmax.f32 %v1850_v34, 0.0  ;;  %v2000_v49 = vadd.f32 %v5049_v19, %v5351_v20  ;;  %v2382_v27 = vmax.f32 %v2002_v6, 0.0  ;;  %v2479_v34 = vld [vmem:[%s5188_s3 + $0x70] sm:$0xff]  ;;  %v2115_v6 = vadd.f32 %v5049_v19, %v5369_v7 }
 0x333   : > { %v2384_v50 = vmax.f32 %v2007_v41, 0.0  ;;  %v2120_v41 = vadd.f32 %v5049_v19, %v5367_v4  ;;  %2777 = vmatmul.f32.vlgmr.msrb.gmra.mxu3 %v2479_v34 }
 0x334   : > { %2794 = vmatpush.msra.mxu1 %v2451_v31  ;;  %2574 = vmatpush.msra.mxu2 %v2275_v25  ;;  %v2472_v31 = vld [vmem:[%s5188_s3 + $0x38] sm:$0xff]  ;;  %v5352_v25 = vld [vmem:[#allocation80_spill] sm:$0xff] }
 0x336   : > { %2795 = vmatpush.msra.mxu1 %v2450_v33  ;;  %2575 = vmatpush.msra.mxu2 %v2274_v60  ;;  %v2383_v33 = vmax.f32 %v2005_v53, 0.0  ;;  %v5353_v60 = vld [vmem:[#allocation77_spill] sm:$0xff]  ;;  %v2117_v53 = vadd.f32 %v5049_v19, %v5368_v36 }
 0x337   : > { %v1995_v2 = vadd.f32 %v5049_v19, %v5353_v60 }
 0x338   : > { %2796 = vmatpush.msra.mxu1 %v2449_v10  ;;  %2576 = vmatpush.msra.mxu2 %v2273_v48  ;;  %v1997_v10 = vadd.f32 %v5049_v19, %v5352_v25  ;;  %v2381_v48 = vmax.f32 %v2000_v49, 0.0  ;;  %v2428_v49 = vmax.f32 %v2117_v53, 0.0  ;;  %v2427_v25 = vmax.f32 %v2115_v6, 0.0 }
 0x339   : > { %2577 = vmatmul.f32.vlgmr.msra.gmra.mxu2 %v2469_v54  ;;  %v5355_v54 = vld [vmem:[#allocation71_spill] sm:$0xff]  ;;  %v2379_v59 = vmax.f32 %v1995_v2, 0.0 }
 0x33a   : > { %2621 = vmatpush.msrb.mxu2 %v2336_v42  ;;  %v2380_v42 = vmax.f32 %v1997_v10, 0.0  ;;  %v1990_v16 = vadd.f32 %v5049_v19, %v5355_v54  ;;  %v5372_v10 = vld [vmem:[#allocation66_spill] sm:$0xff]  ;;  %v5373_v2 = vld [vmem:[#allocation63_spill] sm:$0xff] }
 0x33c   : > { %2622 = vmatpush.msrb.mxu2 %v2335_v21  ;;  %v2477_v21 = vld [vmem:[%s5188_s3 + $0x60] sm:$0xff] }
 0x33d   : > { %2737 = vmatmul.f32.vlgmr.msrb.gmra.mxu1 %v2477_v21 }
 0x33e   : > { %2623 = vmatpush.msrb.mxu2 %v2334_v18  ;;  %v2378_v18 = vmax.f32 %v1992_v14, 0.0  ;;  %v5374_v14 = vld [vmem:[#allocation61_spill] sm:$0xff] }
 0x340   : > { %2624 = vmatpush.msrb.mxu2 %v2333_v43  ;;  %v2377_v43 = vmax.f32 %v1990_v16, 0.0  ;;  %v5375_v16 = vld [vmem:[#allocation58_spill] sm:$0xff] }
 0x342   : > { %2625 = vmatpush.msrb.mxu2 %v2332_v45  ;;  %v2376_v45 = vmax.f32 %v1987_v44, 0.0  ;;  %v2097_v44 = vadd.f32 %v5049_v19, %v5376_v37 }
 0x344   : > { %2626 = vmatpush.msrb.mxu2 %v2331_v55  ;;  %v2375_v55 = vmax.f32 %v1985_v29, 0.0  ;;  %v2095_v29 = vadd.f32 %v5049_v19, %v5377_v30 }
 0x346   : > { %2627 = vmatpush.msrb.mxu2 %v2330_v57  ;;  %v2374_v57 = vmax.f32 %v1982_v39, 0.0  ;;  %v2092_v39 = vadd.f32 %v5049_v19, %v5378_v28 }
 0x348   : > { %2628 = vmatpush.msrb.mxu2 %v2329_v9  ;;  %v2373_v9 = vmax.f32 %v1980_v56, 0.0  ;;  %v2090_v56 = vadd.f32 %v5049_v19, %v5379_v5  ;;  %v2418_v23 = vmax.f32 %v2092_v39, 0.0 }
 0x34a   : > { %2629 = vmatpush.msrb.mxu2 %v2328_v24  ;;  %v2372_v24 = vmax.f32 %v1977_v62, 0.0  ;;  %v2417_v62 = vmax.f32 %v2090_v56, 0.0 }
 0x34c   : > { %2630 = vmatpush.msrb.mxu2 %v2327_v1  ;;  %v2371_v1 = vmax.f32 %v1975_v26, 0.0 }
 0x34e   : > { %2631 = vmatpush.msrb.mxu2 %v2326_v17  ;;  %v2370_v17 = vmax.f32 %v1972_v51, 0.0 }
 0x350   : > { %2632 = vmatpush.msrb.mxu2 %v2325_v12  ;;  %v2369_v12 = vmax.f32 %v1970_v47, 0.0 }
 0x352   : > { %2633 = vmatpush.msrb.mxu2 %v2324_v22  ;;  %v2432_v22 = vmax.f32 %v2127_v11, 0.0  ;;  %v2598_v11 = vpop.f32.mrf.mxu3 }
 0x354   : > { %2634 = vmatpush.msrb.mxu2 %v2323_v52  ;;  %v2480_v52 = vld [vmem:[%s5188_s3 + $0x78] sm:$0xff] }
 0x355   : > { %2797 = vmatmul.f32.vlgmr.msra.gmra.mxu1 %v2480_v52 }
 0x356   : > { %2635 = vmatpush.msrb.mxu2 %v2322_v32  ;;  %v2431_v32 = vmax.f32 %v2125_v15, 0.0 }
 0x358   : > { %2636 = vmatpush.msrb.mxu2 %v2321_v40  ;;  %v2430_v40 = vmax.f32 %v2122_v8, 0.0  ;;  %v2518_v26 = vpop.f32.mrf.mxu2 }
 0x359   : > { %2637 = vmatmul.f32.vlgmr.msrb.gmra.mxu2 %v2472_v31  ;;  %v5370_v31 = vld [vmem:[#allocation72_spill] sm:$0xff] }
 0x35a   : > { %2681 = vmatpush.msra.mxu2 %v2384_v50  ;;  %v2429_v50 = vmax.f32 %v2120_v41, 0.0  ;;  %v2112_v20 = vadd.f32 %v5049_v19, %v5370_v31 }
 0x35c   : > { %2682 = vmatpush.msra.mxu2 %v2383_v33  ;;  %v5371_v33 = vld [vmem:[#allocation69_spill] sm:$0xff]  ;;  %v2426_v60 = vmax.f32 %v2112_v20, 0.0 }
 0x35d   : > { %v2110_v0 = vadd.f32 %v5049_v19, %v5371_v33 }
 0x35e   : > { %2683 = vmatpush.msra.mxu2 %v2382_v27  ;;  %v2107_v27 = vadd.f32 %v5049_v19, %v5372_v10 }
 0x35f   : > { %v2425_v38 = vmax.f32 %v2110_v0, 0.0  ;;  %v3746_v0 = vld [vmem:[%s5190_s5] ss:$0 sm:$0xff] }
 0x360   : > { %2684 = vmatpush.msra.mxu2 %v2381_v48  ;;  %v2105_v48 = vadd.f32 %v5049_v19, %v5373_v2  ;;  %v2424_v54 = vmax.f32 %v2107_v27, 0.0 }
 0x362   : > { %2685 = vmatpush.msra.mxu2 %v2380_v42  ;;  %v2102_v42 = vadd.f32 %v5049_v19, %v5374_v14  ;;  %v2423_v21 = vmax.f32 %v2105_v48, 0.0 }
 0x364   : > { %2686 = vmatpush.msra.mxu2 %v2379_v59  ;;  %v2100_v59 = vadd.f32 %v5049_v19, %v5375_v16  ;;  %v2804_v19 = vld [vmem:[%s5189_s4 + $0x18] sm:$0xff] }
 0x366   : > { %2687 = vmatpush.msra.mxu2 %v2378_v18  ;;  %v2422_v18 = vmax.f32 %v2102_v42, 0.0 }
 0x368   : > { %2688 = vmatpush.msra.mxu2 %v2377_v43  ;;  %v2421_v43 = vmax.f32 %v2100_v59, 0.0 }
 0x36a   : > { %2689 = vmatpush.msra.mxu2 %v2376_v45  ;;  %v2420_v45 = vmax.f32 %v2097_v44, 0.0 }
 0x36c   : > { %2690 = vmatpush.msra.mxu2 %v2375_v55  ;;  %v2419_v55 = vmax.f32 %v2095_v29, 0.0 }
 0x36e   : > { %2691 = vmatpush.msra.mxu2 %v2374_v57  ;;  %v2478_v57 = vld [vmem:[%s5188_s3 + $0x68] sm:$0xff] }
 0x370   : > { %2692 = vmatpush.msra.mxu2 %v2373_v9  ;;  %v2519_v9 = vadd.f32 %v2518_v26, %v2498_v46 }
 0x372   : > { %2693 = vmatpush.msra.mxu2 %v2372_v24  ;;  %v2539_v51 = vadd.f32 %v2538_v58, %v2519_v9  ;;  %v2558_v24 = vpop.f32.mrf.mxu1 }
 0x374   : > { %2694 = vmatpush.msra.mxu2 %v2371_v1  ;;  %v2559_v47 = vadd.f32 %v2558_v24, %v2539_v51  ;;  %v2803_v1 = vld [vmem:[%s5189_s4 + $0x10] sm:$0xff] }
 0x376   : > { %2695 = vmatpush.msra.mxu2 %v2370_v17  ;;  %v2802_v17 = vld [vmem:[%s5189_s4 + $0x8] sm:$0xff] }
 0x378   : > { %2696 = vmatpush.msra.mxu2 %v2369_v12 }
 0x379   : > { %2697 = vmatmul.f32.vlgmr.msra.gmra.mxu2 %v2475_v3  ;;  %v2658_v3 = vpop.f32.mrf.mxu3 }
 0x37a   : > { %2741 = vmatpush.msrb.mxu2 %v2432_v22  ;;  %v2618_v12 = vpop.f32.mrf.mxu1 }
 0x37c   : > { %2742 = vmatpush.msrb.mxu2 %v2431_v32 }
 0x37e   : > { %2743 = vmatpush.msrb.mxu2 %v2430_v40 }
 0x380   : > { %2744 = vmatpush.msrb.mxu2 %v2429_v50 }
 0x382   : > { %2745 = vmatpush.msrb.mxu2 %v2428_v49  ;;  %v2678_v52 = vpop.f32.mrf.mxu1 }
 0x384   : > { %2746 = vmatpush.msrb.mxu2 %v2427_v25 }
 0x386   : > { %2747 = vmatpush.msrb.mxu2 %v2426_v60 }
 0x388   : > { %2748 = vmatpush.msrb.mxu2 %v2425_v38 }
 0x38a   : > { %2749 = vmatpush.msrb.mxu2 %v2424_v54 }
 0x38c   : > { %2750 = vmatpush.msrb.mxu2 %v2423_v21 }
 0x38e   : > { %2751 = vmatpush.msrb.mxu2 %v2422_v18 }
 0x390   : > { %2752 = vmatpush.msrb.mxu2 %v2421_v43 }
 0x392   : > { %2753 = vmatpush.msrb.mxu2 %v2420_v45 }
 0x394   : > { %2754 = vmatpush.msrb.mxu2 %v2419_v55 }
 0x396   : > { %2755 = vmatpush.msrb.mxu2 %v2418_v23 }
 0x398   : > { %2756 = vmatpush.msrb.mxu2 %v2417_v62 }
 0x399   : > { %2757 = vmatmul.f32.vlgmr.msrb.gmra.mxu2 %v2478_v57 }
 0x39a   : > { %2825 = vmatpush.msra.mxu2 %v2804_v19 }
 0x39c   : > { %2826 = vmatpush.msra.mxu2 %v2803_v1  ;;  %v2718_v36 = vpop.f32.mrf.mxu3 }
 0x39e   : > { %2827 = vmatpush.msra.mxu2 %v2802_v17 }
 0x3a0   : > { %2828 = vmatpush.msra.mxu2 %v2801_v61 }
 0x3b6   : > { %v2778_v50 = vpop.f32.mrf.mxu3 }
 0x3ba   : > { %v2738_v53 = vpop.f32.mrf.mxu1 }
 0x3bc   : > { %v2578_v13 = vpop.f32.mrf.mxu2 }
 0x3bd   : > { %v2579_v35 = vadd.f32 %v2578_v13, %v2559_v47 }
 0x3bf   : > { %v2599_v15 = vadd.f32 %v2598_v11, %v2579_v35 }
 0x3c1   : > { %v2619_v8 = vadd.f32 %v2618_v12, %v2599_v15 }
 0x3d2   : > { %v2798_v20 = vpop.f32.mrf.mxu1 }
 0x3dc   : > { %v2638_v63 = vpop.f32.mrf.mxu2 }
 0x3dd   : > { %v2639_v22 = vadd.f32 %v2638_v63, %v2619_v8 }
 0x3df   : > { %v2659_v34 = vadd.f32 %v2658_v3, %v2639_v22 }
 0x3e1   : > { %v2679_v41 = vadd.f32 %v2678_v52, %v2659_v34 }
 0x3fc   : > { %v2698_v4 = vpop.f32.mrf.mxu2 }
 0x3fd   : > { %v2699_v32 = vadd.f32 %v2698_v4, %v2679_v41 }
 0x3ff   : > { %v2719_v40 = vadd.f32 %v2718_v36, %v2699_v32 }
 0x401   : > { %v2739_v7 = vadd.f32 %v2738_v53, %v2719_v40 }
 0x41c   : > { %v2758_v6 = vpop.f32.mrf.mxu2 }
 0x41d   : > { %v2759_v31 = vadd.f32 %v2758_v6, %v2739_v7 }
 0x41f   : > { %v2779_v49 = vadd.f32 %v2778_v50, %v2759_v31 }
 0x421   : > { %v2799_v33 = vadd.f32 %v2798_v20, %v2779_v49 }
 0x423   : > { %3564 = vmatmul.msk.f32.vlgmr.msra.gmra.mxu2 %vm2809_vm3, %v2799_v33 }
 0x4a6   : > { %v2830_v25 = vpop.f32.mrf.mxu2 }
 0x4a7   : > { %v2831_v10 = vadd.f32 %v3746_v0, %v2830_v25 }
 0x4a9   : > { %2833 = vst [vmem:[%s245_s14] sm:$0xff] %v2831_v10 }
 0x4aa   : > { %3776 = shalt.err (!%p3773_p3)
}
 0x4ab   : > { %3705 = dma.vmem_to_hbm [thread:$0]  (%p3887_p5), %s2848_s15, 128, %s2850_s16, %s2835_s17  }
 0x4ac PF: > { %p3711_p4 = scmp.ge.s32.totalorder %s3811_s24, 2  ;;  %s2861_s26 = sand.u32 1, %s3799_s21  }
 0x4ad   : > { %s2862_s10 = scalar_lea.sflag [#allocation3], %s2861_s26 }
 0x4ae   : > { %p3708_p7 = pnand %p3711_p4, %p3891_p6 }
 0x4b0   : > { %p3709_p8 = pneg %p3708_p7 }
 0x4b2   : > { %3794 = dma.done.wait (%p3709_p8), %s2862_s10, 128  }
 0x4b3   : > { %3796 = vsyncadd (%p3709_p8), %s2862_s10, 4294967168  ;;  %p16_p9 = scmp.ge.s32.totalorder %s3874_s27, 10   ;;  %s5380_s21 = smov %s3803_s22 }
 0x4b4   : > { %s5381_s22 = smov %s3807_s23  ;;  %s5382_s23 = smov %s3885_s30 }
 0x4b5   : > { %s5383_s24 = smov %s3874_s27  ;;  %18 = sbr.rel (!%p16_p9) target bundleno = 3 (0x3), region = 79 }
 0x4ba   :  { %2868 = vsyncpa [#allocation3], 1 }
 0x4bb   :  { %2870 = vsyncpa [#allocation3 + $0x1], 1 }

</bundles_post_ra>
